<compile_context>
chip_gen: v5e
topology: v5e:2x2
jax: 0.10.0
libtpu: 0.0.40
codegen_flags: <defaults>
</compile_context>

<pallas_src>
import functools
import math

import numpy as np
import jax
import jax.numpy as jnp
from jax import lax
from jax.experimental import pallas as pl
from jax.experimental.pallas import tpu as pltpu

EPS = 1e-4

_LANE = 128
_FOLD_TARGET_LANES = 512     # preferred folded lane width for small D
_FOLD_MAX_LANES = 1024       # never fold wider than this


def _round_up(a: int, b: int) -> int:
    return ((a + b - 1) // b) * b


def _sublane_for_itemsize(itemsize: int) -> int:
    # f32 -> 8, bf16/f16 -> 16, int8/fp8 -> 32 (sub-32-bit packs along sublanes)
    return {4: 8, 2: 16, 1: 32}.get(itemsize, 8)


def _vmem_capacity_bytes() -> int:
    try:
        return int(pltpu.get_tpu_info().vmem_capacity_bytes)
    except Exception:
        return 64 * 1024 * 1024   # conservative fallback (v7x per-TC VMEM)


def _choose_block_rows(rf: int, w: int, itemsize: int, sublane: int, vmem_cap: int) -> int:
    small_vmem = vmem_cap <= (64 << 20)                 # v7x-like (2 TCs, 64 MiB/TC)
    target_block_bytes = (6 << 20) if small_vmem else (10 << 20)
    # VMEM model per element: double-buffered in + out (4*itemsize) plus ~8 B f32 temps.
    per_elem_vmem = 4 * itemsize + 8
    vmem_rows = int(0.7 * vmem_cap) // max(1, w * per_elem_vmem)
    tgt_rows = target_block_bytes // max(1, w * itemsize)
    br = min(tgt_rows, vmem_rows)
    br = max(sublane, (br // sublane) * sublane)

    # Keep several grid steps (per-TC pipelining + megacore) as long as each
    # per-buffer tile stays above ~1.5 MiB.
    desired_steps = 8 if small_vmem else 4
    min_tile_bytes = 3 << 19
    if rf >= desired_steps * sublane:
        cap_rows = _round_up(-(-rf // desired_steps), sublane)
        floor_rows = max(sublane,
                         (min_tile_bytes // max(1, w * itemsize)) // sublane * sublane)
        br = min(br, max(cap_rows, floor_rows))

    br = min(br, _round_up(rf, sublane))
    return max(sublane, br)


def _norm_kernel(x_ref, o_ref, *, eps):
    """Per-row L2 normalize: last dim of the tile is one full logical row."""
    xf = x_ref[...].astype(jnp.float32)
    ss = jnp.sum(xf * xf, axis=-1, keepdims=True)               # (br, 1)
    inv = pl.reciprocal(jnp.sqrt(ss) + eps, approx=False)       # 1 EUP op per row
    o_ref[...] = (xf * inv).astype(o_ref.dtype)                 # scale in f32, cast once


def _norm_fold_kernel(x_ref, seg_ref, segt_ref, o_ref, *, eps):
    """Lane-dense small-D path: each tile row packs num_seg logical rows of length d.

    Segmented sum-of-squares and the broadcast-back use tiny MXU matmuls against a
    constant 0/1 segment matrix (resident across grid steps; MXU is otherwise idle).
    """
    xf = x_ref[...].astype(jnp.float32)
    ss = jnp.dot(xf * xf, seg_ref[...],
                 preferred_element_type=jnp.float32,
                 precision=lax.Precision.HIGHEST)               # (br, num_seg)
    inv = pl.reciprocal(jnp.sqrt(ss) + eps, approx=False)       # 1 per logical row
    inv_full = jnp.dot(inv, segt_ref[...],
                       preferred_element_type=jnp.float32,
                       precision=lax.Precision.HIGHEST)         # (br, w)
    o_ref[...] = (xf * inv_full).astype(o_ref.dtype)


def l2_norm(x, *, eps=EPS, donate_input=False):
    """x: (..., D) -> x / (||x||_2 along last dim + eps), matching PyTorch Norm."""
    orig_shape = x.shape
    d = orig_shape[-1]
    if d == 0 or math.prod(orig_shape) == 0:
        return x

    x2d = x.reshape(-1, d)            # contiguous reshape: free
    r = x2d.shape[0]

    itemsize = jnp.dtype(x.dtype).itemsize
    sublane = _sublane_for_itemsize(itemsize)
    vmem_cap = _vmem_capacity_bytes()

    # --- lane-dense folding for small last dims ------------------------------
    # Fold num_seg consecutive rows into one lane-dense row of width
    # w = lcm(d, 128) (scaled toward ~512 lanes) so stores are unmasked.
    num_seg = 1
    w = d
    if d < _LANE:
        w_lcm = (d * _LANE) // math.gcd(d, _LANE)
        if w_lcm <= _FOLD_MAX_LANES:
            w = w_lcm * max(1, _FOLD_TARGET_LANES // w_lcm)
            num_seg = w // d

    if num_seg > 1:
        # Pad only to a multiple of num_seg (never to a multiple of br); the tail
        # segments normalize to garbage but are sliced off after un-folding.
        r_pad = _round_up(r, num_seg)
        if r_pad != r:
            x2d = jnp.pad(x2d, ((0, r_pad - r), (0, 0)))
        rf = r_pad // num_seg
        xw = x2d.reshape(rf, w)       # contiguous reshape: free
    else:
        r_pad = r
        rf = r
        xw = x2d

    br = _choose_block_rows(rf, w, itemsize, sublane, vmem_cap)
    grid = (pl.cdiv(rf, br),)         # partial last block handled by Pallas masking

    # TODO(synk): very large D (one row block exceeding the VMEM budget) would need a
    # two-pass partial-sum-of-squares variant; single-pass assumes a row block fits VMEM.
    cost = pl.CostEstimate(
        flops=3 * rf * w,
        transcendentals=2 * rf * num_seg,            # sqrt + reciprocal per logical row
        bytes_accessed=2 * rf * w * itemsize,
    )
    cparams = pltpu.CompilerParams(
        dimension_semantics=("parallel",),
        vmem_limit_bytes=min(int(0.75 * vmem_cap), 100 << 20),
    )
    io_alias = {0: 0} if donate_input else {}

    kern_name = None
    if num_seg > 1:
        # Constant segment matrices built once on the host; resident in VMEM across
        # all grid steps via the constant (0, 0) index_map.
        jj = np.arange(w)[:, None]
        ss_idx = np.arange(num_seg)[None, :]
        seg_np = ((jj >= ss_idx * d) & (jj < (ss_idx + 1) * d)).astype(np.float32)
        seg = jnp.asarray(seg_np)                    # (w, num_seg)
        seg_t = jnp.asarray(seg_np.T)                # (num_seg, w)

        out = pl.pallas_call(
            functools.partial(_norm_fold_kernel, eps=float(eps)),
            out_shape=jax.ShapeDtypeStruct((rf, w), x.dtype),
            grid_spec=pltpu.PrefetchScalarGridSpec(
                num_scalar_prefetch=0,
                grid=grid,
                in_specs=[pl.BlockSpec((br, w), lambda i: (i, 0)),
                          pl.BlockSpec((w, num_seg), lambda i: (0, 0)),
                          pl.BlockSpec((num_seg, w), lambda i: (0, 0))],
                out_specs=pl.BlockSpec((br, w), lambda i: (i, 0)),
            ),
            compiler_params=cparams,
            cost_estimate=cost,
            input_output_aliases=io_alias,
        )(xw, seg, seg_t)
        out = out.reshape(r_pad, d)
        if r_pad != r:
            out = out[:r]
        return out.reshape(orig_shape)
    else:
        out = pl.pallas_call(
            functools.partial(_norm_kernel, eps=float(eps)),
            out_shape=jax.ShapeDtypeStruct((rf, w), x.dtype),
            grid_spec=pltpu.PrefetchScalarGridSpec(
                num_scalar_prefetch=0,
                grid=grid,
                in_specs=[pl.BlockSpec((br, w), lambda i: (i, 0))],
                out_specs=pl.BlockSpec((br, w), lambda i: (i, 0)),
            ),
            compiler_params=cparams,
            cost_estimate=cost,
            input_output_aliases=io_alias,
        )(xw)
        return out.reshape(orig_shape)


if __name__ == "__main__":
    # TODO(synk): the torch.isfinite asserts have no in-kernel equivalent; checked host-side here.
    key = jax.random.PRNGKey(0)
    k1, k2, k3, k4, k5 = jax.random.split(key, 5)

    def _ref(v):
        return v / (jnp.linalg.norm(v, ord=2, axis=-1, keepdims=True) + EPS)

    # Shape implied by the module's usage: (batch, seq, hidden) with small hidden.
    x_small = jax.random.normal(k1, (2, 8, 32), dtype=jnp.float32)     # fold path, 128|512
    x_wide = jax.random.normal(k2, (2, 8, 256), dtype=jnp.float32)     # no-fold path
    x_odd = jax.random.normal(k3, (3, 5, 32), dtype=jnp.float32)       # fold path, row pad
    x_lcm = jax.random.normal(k4, (2, 7, 48), dtype=jnp.float32)       # general lcm fold (w=384)
    x_tail = jax.random.normal(k5, (3, 5, 256), dtype=jnp.float32)     # no-fold, partial block

    for x in (x_small, x_wide, x_odd, x_lcm, x_tail):
        assert bool(jnp.isfinite(x).all())
        y = jax.block_until_ready(l2_norm(x))
        assert y.shape == x.shape and y.dtype == x.dtype
        assert bool(jnp.isfinite(y).all())
        assert jnp.allclose(y, _ref(x), atol=1e-5, rtol=1e-5)

    print("KERNEL_OK")
</pallas_src>

<mosaic_0001>
module attributes {stable_mosaic.version = 11 : i64} {
  func.func @_norm_fold_kernel(%arg0: i32, %arg1: memref<8x512xf32, #tpu.memory_space<vmem>>, %arg2: memref<512x16xf32, #tpu.memory_space<vmem>>, %arg3: memref<16x512xf32, #tpu.memory_space<vmem>>, %arg4: memref<8x512xf32, #tpu.memory_space<vmem>>) attributes {dimension_semantics = [#tpu.dimension_semantics<parallel>], iteration_bounds = array<i64: 1>, scalar_prefetch = 0 : i64, scratch_operands = 0 : i64, tpu.core_type = #tpu.core_type<tc>, window_params = [{transform_indices = @transform_0, window_bounds = array<i64: 8, 512>}, {pipeline_mode = #tpu.pipeline_mode<synchronous>, transform_indices = @transform_1, window_bounds = array<i64: 512, 16>}, {pipeline_mode = #tpu.pipeline_mode<synchronous>, transform_indices = @transform_2, window_bounds = array<i64: 16, 512>}, {transform_indices = @transform_3, window_bounds = array<i64: 8, 512>}]} {
    %c0 = arith.constant 0 : index
    %c0_0 = arith.constant 0 : index
    %0 = vector.load %arg1[%c0, %c0_0] : memref<8x512xf32, #tpu.memory_space<vmem>>, vector<8x512xf32>
    %1 = arith.mulf %0, %0 : vector<8x512xf32>
    %c0_1 = arith.constant 0 : index
    %c0_2 = arith.constant 0 : index
    %2 = vector.load %arg2[%c0_1, %c0_2] : memref<512x16xf32, #tpu.memory_space<vmem>>, vector<512x16xf32>
    %cst = arith.constant dense<0.000000e+00> : vector<8x16xf32>
    %3 = tpu.matmul %1, %2, %cst {dimension_numbers = #tpu.dot_dimension_numbers<[1], [0], [0], [1], [0, 0, 1, 1], [], []>, precision = #tpu.contract_precision<fp32>} : vector<8x512xf32>, vector<512x16xf32>, vector<8x16xf32> -> vector<8x16xf32>
    %4 = math.sqrt %3 : vector<8x16xf32>
    %cst_3 = arith.constant 9.99999974E-5 : f32
    %5 = vector.broadcast %cst_3 : f32 to vector<8x16xf32>
    %6 = arith.addf %4, %5 : vector<8x16xf32>
    %7 = tpu.reciprocal %6 : vector<8x16xf32> -> vector<8x16xf32>
    %c0_4 = arith.constant 0 : index
    %c0_5 = arith.constant 0 : index
    %8 = vector.load %arg3[%c0_4, %c0_5] : memref<16x512xf32, #tpu.memory_space<vmem>>, vector<16x512xf32>
    %cst_6 = arith.constant dense<0.000000e+00> : vector<8x512xf32>
    %9 = tpu.matmul %7, %8, %cst_6 {dimension_numbers = #tpu.dot_dimension_numbers<[1], [0], [0], [1], [0, 0, 1, 1], [], []>, precision = #tpu.contract_precision<fp32>} : vector<8x16xf32>, vector<16x512xf32>, vector<8x512xf32> -> vector<8x512xf32>
    %10 = arith.mulf %0, %9 : vector<8x512xf32>
    %c0_7 = arith.constant 0 : index
    %c0_8 = arith.constant 0 : index
    %11 = vector.load %arg4[%c0_7, %c0_8] : memref<8x512xf32, #tpu.memory_space<vmem>>, vector<8x512xf32>
    tpu.vector_store %arg4[%c0_7, %c0_8], %10 {strides = array<i32>} : memref<8x512xf32, #tpu.memory_space<vmem>>, vector<8x512xf32>,
    return
  }
  func.func @transform_0(%arg0: i32) -> (i32, i32) {
    %c0_i32 = arith.constant 0 : i32
    %c0_i32_0 = arith.constant 0 : i32
    return %arg0, %c0_i32 : i32, i32
  }
  func.func @transform_1(%arg0: i32) -> (i32, i32) {
    %c0_i32 = arith.constant 0 : i32
    %c0_i32_0 = arith.constant 0 : i32
    %c0_i32_1 = arith.constant 0 : i32
    return %c0_i32, %c0_i32_0 : i32, i32
  }
  func.func @transform_2(%arg0: i32) -> (i32, i32) {
    %c0_i32 = arith.constant 0 : i32
    %c0_i32_0 = arith.constant 0 : i32
    %c0_i32_1 = arith.constant 0 : i32
    return %c0_i32, %c0_i32_0 : i32, i32
  }
  func.func @transform_3(%arg0: i32) -> (i32, i32) {
    %c0_i32 = arith.constant 0 : i32
    %c0_i32_0 = arith.constant 0 : i32
    return %arg0, %c0_i32 : i32, i32
  }
}

</mosaic_0001>

<bundles_post_ra>
// kernel: tpu_custom_call.1
= control target key start
LH: loop header
LB: loop body
LE: loop exit
PB: predicated region body
PF: predicated region fallthrough
CT: control target
= control target key end

     0   :  { %8 = vsyncpa [#allocation3], 0  ;;  %vm1525_vm5 = vcmask 130048   ;;  %vm2172_vm7 = vcmask 1040384   ;;  %vm2174_vm8 = vcmask 1042434   ;;  %vm2178_vm9 = vcmask 1041409   ;;  %s3719_s0 = inlined_call_operand.vmem [shape: f32[1,512], index: 0, kind: input, shape index: {}]   ;;  %s3720_s1 = inlined_call_operand.vmem [shape: f32[512,16], index: 1, kind: input, shape index: {}]   ;;  %s3721_s2 = inlined_call_operand.vmem [shape: f32[16,512], index: 2, kind: input, shape index: {}]   ;;  %s3722_s3 = inlined_call_operand.hbm [shape: f32[1,512], index: 3, kind: output, shape index: {}]  }
   0x1   :  { %v46_v0 = vld [vmem:[%s3720_s1 + $0x78] sm:$0xff]  ;;  %v45_v1 = vld [vmem:[%s3720_s1 + $0x70] sm:$0xff]  ;;  %v44_v4 = vld [vmem:[%s3720_s1 + $0x68] sm:$0xff]  ;;  %vm2180_vm10 = vcmask 1043459   ;;  %vm2186_vm11 = vcmask 1044484   ;;  %vm2192_vm12 = vcmask 1045509  }
   0x2   :  { %v2335_v2 = vand.u32 4294901760, %v46_v0  ;;  %v2337_v3 = vand.u32 4294901760, %v45_v1  ;;  %v43_v5 = vld [vmem:[%s3720_s1 + $0x60] sm:$0xff]  ;;  %v42_v6 = vld [vmem:[%s3720_s1 + $0x58] sm:$0xff]  ;;  %v2348_v7 = vand.u32 4294901760, %v44_v4  ;;  %v41_v10 = vld [vmem:[%s3720_s1 + $0x50] sm:$0xff] }
   0x3   :  { %v2350_v8 = vand.u32 4294901760, %v43_v5  ;;  %v2352_v9 = vand.u32 4294901760, %v42_v6  ;;  %v40_v11 = vld [vmem:[%s3720_s1 + $0x48] sm:$0xff]  ;;  %v39_v12 = vld [vmem:[%s3720_s1 + $0x40] sm:$0xff]  ;;  %v2371_v15 = vand.u32 4294901760, %v41_v10  ;;  %v38_v21 = vld [vmem:[%s3720_s1 + $0x38] sm:$0xff] }
   0x4   :  { %127 = vmatpush.msra.mxu0 %v2335_v2  ;;  %v2365_v13 = vsub.f32 %v46_v0, %v2335_v2  ;;  %v2368_v14 = vsub.f32 %v45_v1, %v2337_v3  ;;  %323 = vmatpush.msra.mxu3 %v2335_v2  ;;  %v2373_v16 = vand.u32 4294901760, %v40_v11  ;;  %v2376_v17 = vsub.f32 %v44_v4, %v2348_v7  ;;  %v37_v25 = vld [vmem:[%s3720_s1 + $0x30] sm:$0xff]  ;;  %v36_v33 = vld [vmem:[%s3720_s1 + $0x28] sm:$0xff]  ;;  %v35_v43 = vld [vmem:[%s3720_s1 + $0x20] sm:$0xff] }
   0x5   :  { %v2379_v18 = vsub.f32 %v43_v5, %v2350_v8  ;;  %v2382_v19 = vsub.f32 %v42_v6, %v2352_v9  ;;  %v2384_v20 = vand.u32 4294901760, %v39_v12  ;;  %v2394_v24 = vsub.f32 %v41_v10, %v2371_v15  ;;  %v34_v48 = vld [vmem:[%s3720_s1 + $0x18] sm:$0xff]  ;;  %v33_v55 = vld [vmem:[%s3720_s1 + $0x10] sm:$0xff]  ;;  %v32_v59 = vld [vmem:[%s3720_s1 + $0x8] sm:$0xff] }
   0x6   :  { %129 = vmatpush.msra.mxu0 %v2337_v3  ;;  %270 = vmatpush.msra.mxu2 %v2365_v13  ;;  %v169_v22 = vand.u32 4294901760, %v2365_v13  ;;  %v3738_v23 = vand.u32 4294901760, %v2368_v14  ;;  %v3737_v26 = vand.u32 4294901760, %v2376_v17  ;;  %v2403_v28 = vsub.f32 %v40_v11, %v2373_v16  ;;  %v62_v61 = vld [vmem:[%s3720_s1 + $0xf8] sm:$0xff]  ;;  %v61_v62 = vld [vmem:[%s3720_s1 + $0xf0] sm:$0xff]  ;;  %v31_v11 = vld [vmem:[%s3720_s1] sm:$0xff] }
   0x7   :  { %325 = vmatpush.msra.mxu3 %v2337_v3  ;;  %v3733_v27 = vand.u32 4294901760, %v2379_v18  ;;  %v2413_v31 = vand.u32 4294901760, %v38_v21  ;;  %v3732_v32 = vand.u32 4294901760, %v2382_v19  ;;  %v2423_v35 = vand.u32 4294901760, %v37_v25 }
   0x8   :  { %131 = vmatpush.msra.mxu0 %v2348_v7  ;;  %273 = vmatpush.msra.mxu2 %v2368_v14  ;;  %v170_v29 = vsub.f32 %v2365_v13, %v169_v22  ;;  %v176_v30 = vsub.f32 %v2368_v14, %v3738_v23  ;;  %v182_v34 = vsub.f32 %v2376_v17, %v3737_v26  ;;  %v3731_v40 = vand.u32 4294901760, %v2394_v24 }
   0x9   :  { %327 = vmatpush.msra.mxu3 %v2348_v7  ;;  %v2426_v36 = vsub.f32 %v39_v12, %v2384_v20  ;;  %v188_v39 = vsub.f32 %v2379_v18, %v3733_v27  ;;  %v2435_v41 = vand.u32 4294901760, %v36_v33  ;;  %v3729_v42 = vand.u32 4294901760, %v2403_v28 }
   0xa   :  { %133 = vmatpush.msra.mxu0 %v2350_v8  ;;  %v171_v37 = vand.u32 4294901760, %v170_v29  ;;  %276 = vmatpush.msra.mxu2 %v2376_v17  ;;  %v177_v38 = vand.u32 4294901760, %v176_v30  ;;  %v183_v44 = vand.u32 4294901760, %v182_v34  ;;  %v194_v45 = vsub.f32 %v2382_v19, %v3732_v32 }
   0xb   :  { %329 = vmatpush.msra.mxu3 %v2350_v8  ;;  %v2446_v46 = vsub.f32 %v38_v21, %v2413_v31  ;;  %v3728_v47 = vand.u32 4294901760, %v2426_v36  ;;  %v189_v49 = vand.u32 4294901760, %v188_v39  ;;  %v200_v50 = vsub.f32 %v2394_v24, %v3731_v40 }
   0xc   :  { %135 = vmatpush.msra.mxu0 %v2352_v9  ;;  %172 = vmatpush.msra.mxu1 %v171_v37  ;;  %v2458_v51 = vand.u32 4294901760, %v35_v43  ;;  %v2461_v52 = vsub.f32 %v37_v25, %v2423_v35  ;;  %v206_v53 = vsub.f32 %v2403_v28, %v3729_v42  ;;  %v2469_v54 = vsub.f32 %v36_v33, %v2435_v41  ;;  %v60_v33 = vld [vmem:[%s3720_s1 + $0xe8] sm:$0xff]  ;;  %v55_v42 = vld [vmem:[%s3720_s1 + $0xc0] sm:$0xff] }
   0xd   :  { %279 = vmatpush.msra.mxu2 %v2379_v18  ;;  %331 = vmatpush.msra.mxu3 %v2352_v9  ;;  %v195_v56 = vand.u32 4294901760, %v194_v45  ;;  %v2475_v57 = vand.u32 4294901760, %v34_v48  ;;  %v3726_v58 = vand.u32 4294901760, %v2446_v46  ;;  %v212_v60 = vsub.f32 %v2426_v36, %v3728_v47 }
   0xe   :  { %137 = vmatpush.msra.mxu0 %v2371_v15  ;;  %178 = vmatpush.msra.mxu1 %v177_v38  ;;  %v201_v63 = vand.u32 4294901760, %v200_v50  ;;  %v2493_v0 = vand.u32 4294901760, %v33_v55  ;;  %v3725_v1 = vand.u32 4294901760, %v2461_v52  ;;  %v2497_v4 = vsub.f32 %v35_v43, %v2458_v51  ;;  %v59_v43 = vld [vmem:[%s3720_s1 + $0xe0] sm:$0xff] }
   0xf   :  { %282 = vmatpush.msra.mxu2 %v2382_v19  ;;  %333 = vmatpush.msra.mxu3 %v2371_v15  ;;  %3775 = vst [vmem:[#allocation5_spill] sm:$0xff] %v2475_v57  ;;  %v207_v5 = vand.u32 4294901760, %v206_v53  ;;  %v2501_v6 = vand.u32 4294901760, %v32_v59  ;;  %v3724_v10 = vand.u32 4294901760, %v2469_v54  ;;  %v218_v12 = vsub.f32 %v2446_v46, %v3726_v58  ;;  %v56_v58 = vld [vmem:[%s3720_s1 + $0xc8] sm:$0xff] }
  0x10   :  { %139 = vmatpush.msra.mxu0 %v2373_v16  ;;  %184 = vmatpush.msra.mxu1 %v183_v44  ;;  %3776 = vst [vmem:[#allocation6_spill] sm:$0xff] %v2493_v0  ;;  %v2512_v21 = vsub.f32 %v34_v48, %v2475_v57  ;;  %v2514_v25 = vand.u32 4294901760, %v62_v61  ;;  %v2516_v29 = vand.u32 4294901760, %v61_v62  ;;  %v213_v30 = vand.u32 4294901760, %v212_v60 }
  0x11   :  { %285 = vmatpush.msra.mxu2 %v2394_v24  ;;  %335 = vmatpush.msra.mxu3 %v2373_v16  ;;  %3777 = vst [vmem:[#allocation7_spill] sm:$0xff] %v2501_v6  ;;  %v224_v34 = vsub.f32 %v2461_v52, %v3725_v1  ;;  %v2527_v37 = vand.u32 4294901760, %v31_v11  ;;  %v3723_v38 = vand.u32 4294901760, %v2497_v4  ;;  %v2531_v39 = vsub.f32 %v33_v55, %v2493_v0 }
  0x12   :  { %141 = vmatpush.msra.mxu0 %v2384_v20  ;;  %190 = vmatpush.msra.mxu1 %v189_v49  ;;  %v230_v44 = vsub.f32 %v2469_v54, %v3724_v10  ;;  %v2542_v45 = vsub.f32 %v32_v59, %v2501_v6  ;;  %v2545_v48 = vsub.f32 %v62_v61, %v2514_v25  ;;  %v219_v49 = vand.u32 4294901760, %v218_v12 }
  0x13   :  { %288 = vmatpush.msra.mxu2 %v2403_v28  ;;  %337 = vmatpush.msra.mxu3 %v2384_v20  ;;  %3778 = vst [vmem:[#allocation8_spill] sm:$0xff] %v2527_v37  ;;  %v3727_v50 = vand.u32 4294901760, %v2512_v21  ;;  %v2549_v53 = vand.u32 4294901760, %v60_v33  ;;  %v2552_v55 = vsub.f32 %v61_v62, %v2516_v29  ;;  %v2559_v59 = vand.u32 4294901760, %v59_v43 }
  0x14   :  { %143 = vmatpush.msra.mxu0 %v2413_v31  ;;  %196 = vmatpush.msra.mxu1 %v195_v56  ;;  %v58_v56 = vld [vmem:[%s3720_s1 + $0xd8] sm:$0xff]  ;;  %v225_v60 = vand.u32 4294901760, %v224_v34  ;;  %v236_v61 = vsub.f32 %v2497_v4, %v3723_v38  ;;  %v3730_v62 = vand.u32 4294901760, %v2531_v39  ;;  %v3735_v12 = vand.u32 4294901760, %v2542_v45 }
  0x15   :  { %291 = vmatpush.msra.mxu2 %v2426_v36  ;;  %339 = vmatpush.msra.mxu3 %v2413_v31  ;;  %3779 = vst [vmem:[#allocation9_spill] sm:$0xff] %v2552_v55  ;;  %v2576_v34 = vand.u32 4294901760, %v58_v56  ;;  %v231_v38 = vand.u32 4294901760, %v230_v44  ;;  %v3736_v10 = vand.u32 4294901760, %v2552_v55  ;;  %v2584_v1 = vsub.f32 %v60_v33, %v2549_v53 }
  0x16   :  { %145 = vmatpush.msra.mxu0 %v2423_v35  ;;  %202 = vmatpush.msra.mxu1 %v201_v63  ;;  %v2567_v63 = vsub.f32 %v31_v11, %v2527_v37  ;;  %v242_v11 = vsub.f32 %v2512_v21, %v3727_v50  ;;  %v237_v50 = vand.u32 4294901760, %v236_v61  ;;  %v248_v33 = vsub.f32 %v2531_v39, %v3730_v62 }
  0x17   :  { %294 = vmatpush.msra.mxu2 %v2446_v46  ;;  %341 = vmatpush.msra.mxu3 %v2423_v35  ;;  %3780 = vst [vmem:[#allocation10_spill] sm:$0xff] %v2584_v1  ;;  %v2613_v61 = vsub.f32 %v58_v56, %v2576_v34  ;;  %v2615_v62 = vand.u32 4294901760, %v56_v58  ;;  %v517_v32 = vsub.f32 %v2552_v55, %v3736_v10  ;;  %vm2204_vm14 = vcmask 1046528  }
  0x18   :  { %147 = vmatpush.msra.mxu0 %v2435_v41  ;;  %208 = vmatpush.msra.mxu1 %v207_v5  ;;  %v57_v5 = vld [vmem:[%s3720_s1 + $0xd0] sm:$0xff]  ;;  %v3739_v47 = vand.u32 4294901760, %v2567_v63  ;;  %v243_v40 = vand.u32 4294901760, %v242_v11  ;;  %v15_v11 = vld [vmem:[%s3719_s0] sm:$0xf]  ;;  %v249_v10 = vand.u32 4294901760, %v248_v33 }
  0x19   :  { %297 = vmatpush.msra.mxu2 %v2461_v52  ;;  %343 = vmatpush.msra.mxu3 %v2435_v41  ;;  %v2594_v44 = vand.u32 4294901760, %v57_v5  ;;  %3782 = vst [vmem:[#allocation12_spill] sm:$0xff] %v2613_v61  ;;  %v2651_v27 = vsub.f32 %v56_v58, %v2615_v62  ;;  %v518_v13 = vand.u32 4294901760, %v517_v32  ;;  %v19_v58 = vld [vmem:[%s3719_s0 + $0x10] sm:$0xf]  ;;  %v23_v33 = vmul.f32 %v15_v11, %v15_v11 }
  0x1a   :  { %149 = vmatpush.msra.mxu0 %v2458_v51  ;;  %214 = vmatpush.msra.mxu1 %v213_v30  ;;  %v3734_v30 = vand.u32 4294901760, %v2545_v48  ;;  %v260_v26 = vsub.f32 %v2567_v63, %v3739_v47  ;;  %v53_v47 = vld [vmem:[%s3720_s1 + $0xb0] sm:$0xff]  ;;  %vm2176_vm15 = vcmask 1041408  }
  0x1b   :  { %300 = vmatpush.msra.mxu2 %v2469_v54  ;;  %345 = vmatpush.msra.mxu3 %v2458_v51  ;;  %v2626_v56 = vsub.f32 %v57_v5, %v2594_v44  ;;  %v16_v5 = vld [vmem:[%s3719_s0 + $0x4] sm:$0xf]  ;;  %v2685_v55 = vand.u32 4294901760, %v53_v47  ;;  %103 = vst [vmem:[#allocation1] ss:$9 sm:$0xff] %v23_v33  ;;  %v3788_v33 = vand.u32 4294901760, %v2379_v18 }
  0x1c   :  { %151 = vmatpush.msra.mxu0 %v2475_v57  ;;  %220 = vmatpush.msra.mxu1 %v219_v49  ;;  %v2592_v49 = vsub.f32 %v59_v43, %v2559_v59  ;;  %v254_v43 = vsub.f32 %v2542_v45, %v3735_v12  ;;  %v2628_v12 = vand.u32 4294901760, %v55_v42  ;;  %v261_v11 = vand.u32 4294901760, %v260_v26  ;;  %v51_v26 = vld [vmem:[%s3720_s1 + $0xa0] sm:$0xff] }
  0x1d   :  { %303 = vmatpush.msra.mxu2 %v2497_v4  ;;  %347 = vmatpush.msra.mxu3 %v2475_v57  ;;  %v3787_v57 = vand.u32 4294901760, %v2613_v61  ;;  %v2719_v18 = vsub.f32 %v53_v47, %v2685_v55 }
  0x1e   :  { %3781 = vst [vmem:[#allocation11_spill] sm:$0xff] %v2592_v49  ;;  %153 = vmatpush.msra.mxu0 %v2493_v0  ;;  %226 = vmatpush.msra.mxu1 %v225_v60  ;;  %v511_v60 = vsub.f32 %v2545_v48, %v3734_v30  ;;  %v17_v30 = vld [vmem:[%s3719_s0 + $0x8] sm:$0xf]  ;;  %v255_v23 = vand.u32 4294901760, %v254_v43 }
  0x1f   :  { %306 = vmatpush.msra.mxu2 %v2512_v21  ;;  %349 = vmatpush.msra.mxu3 %v2493_v0  ;;  %v3784_v0 = vand.u32 4294901760, %v2368_v14  ;;  %v20_v14 = vld [vmem:[%s3719_s0 + $0x14] sm:$0xf] }
  0x20   :  { %155 = vmatpush.msra.mxu0 %v2501_v6  ;;  %232 = vmatpush.msra.mxu1 %v231_v38  ;;  %v54_v38 = vld [vmem:[%s3720_s1 + $0xb8] sm:$0xff] }
  0x21   :  { %309 = vmatpush.msra.mxu2 %v2531_v39  ;;  %351 = vmatpush.msra.mxu3 %v2501_v6  ;;  %v18_v6 = vld [vmem:[%s3719_s0 + $0xc] sm:$0xf] }
  0x22   :  { %157 = vmatpush.msra.mxu0 %v2527_v37  ;;  %238 = vmatpush.msra.mxu1 %v237_v50  ;;  %v512_v50 = vand.u32 4294901760, %v511_v60  ;;  %v2663_v60 = vand.u32 4294901760, %v54_v38 }
  0x23   :  { %312 = vmatpush.msra.mxu2 %v2542_v45  ;;  %353 = vmatpush.msra.mxu3 %v2527_v37  ;;  %v26_v37 = vmul.f32 %v18_v6, %v18_v6  ;;  %v27_v6 = vmul.f32 %v19_v58, %v19_v58 }
  0x24   :  { %364 = vmatpush.msrb.mxu0 %v169_v22  ;;  %244 = vmatpush.msra.mxu1 %v243_v40  ;;  %v3783_v22 = vand.u32 4294901760, %v2584_v1  ;;  %v3785_v40 = vand.u32 4294901760, %v2592_v49 }
  0x25   :  { %315 = vmatpush.msra.mxu2 %v2567_v63  ;;  %513 = vmatpush.msrb.mxu3 %v512_v50  ;;  %109 = vst [vmem:[#allocation1 + $0x3] ss:$9 sm:$0xff] %v26_v37 }
  0x26   :  { %v523_v43 = vsub.f32 %v2584_v1, %v3783_v22  ;;  %368 = vmatpush.msrb.mxu0 %v3784_v0  ;;  %v529_v32 = vsub.f32 %v2592_v49, %v3785_v40  ;;  %v2676_v22 = vsub.f32 %v55_v42, %v2628_v12  ;;  %v52_v1 = vld [vmem:[%s3720_s1 + $0xa8] sm:$0xff]  ;;  %v24_v0 = vmul.f32 %v16_v5, %v16_v5  ;;  %v21_v42 = vld [vmem:[%s3719_s0 + $0x18] sm:$0xf] }
  0x27   :  { %250 = vmatpush.msra.mxu1 %v249_v10  ;;  %468 = vmatpush.msrb.mxu2 %v2514_v25  ;;  %v25_v40 = vmul.f32 %v17_v30, %v17_v30  ;;  %v3786_v49 = vand.u32 4294901760, %v2376_v17  ;;  %v535_v10 = vsub.f32 %v2613_v61, %v3787_v57  ;;  %v22_v30 = vld [vmem:[%s3719_s0 + $0x1c] sm:$0xf]  ;;  %v2706_v50 = vand.u32 4294901760, %v52_v1  ;;  %111 = vst [vmem:[#allocation1 + $0x4] ss:$9 sm:$0xff] %v27_v6 }
  0x28   :  { %v524_v17 = vand.u32 4294901760, %v523_v43  ;;  %v28_v57 = vmul.f32 %v20_v14, %v20_v14  ;;  %105 = vst [vmem:[#allocation1 + $0x1] ss:$9 sm:$0xff] %v24_v0  ;;  %519 = vmatpush.msrb.mxu3 %v518_v13  ;;  %v530_v5 = vand.u32 4294901760, %v529_v32  ;;  %v3789_v61 = vand.u32 4294901760, %v2626_v56 }
  0x29   :  { %372 = vmatpush.msrb.mxu0 %v3786_v49  ;;  %256 = vmatpush.msra.mxu1 %v255_v23  ;;  %v2704_v49 = vsub.f32 %v54_v38, %v2663_v60  ;;  %v50_v23 = vld [vmem:[%s3720_s1 + $0x98] sm:$0xff]  ;;  %v29_v43 = vmul.f32 %v21_v42, %v21_v42  ;;  %107 = vst [vmem:[#allocation1 + $0x2] ss:$9 sm:$0xff] %v25_v40  ;;  %v552_v38 = vand.u32 4294901760, %v2676_v22  ;;  %v2721_v13 = vand.u32 4294901760, %v51_v26 }
  0x2a   :  { %470 = vmatpush.msrb.mxu2 %v2516_v29  ;;  %v541_v58 = vsub.f32 %v2626_v56, %v3789_v61  ;;  %v30_v32 = vmul.f32 %v22_v30, %v22_v30  ;;  %v3790_v61 = vand.u32 4294901760, %v2382_v19  ;;  %v3791_v14 = vand.u32 4294901760, %v2651_v27  ;;  %525 = vmatpush.msrb.mxu3 %v524_v17  ;;  %113 = vst [vmem:[#allocation1 + $0x5] ss:$9 sm:$0xff] %v28_v57 }
  0x2b   :  { %376 = vmatpush.msrb.mxu0 %v3788_v33  ;;  %262 = vmatpush.msra.mxu1 %v261_v11  ;;  %v536_v11 = vand.u32 4294901760, %v535_v10  ;;  %v558_v47 = vand.u32 4294901760, %v2704_v49  ;;  %v2732_v42 = vsub.f32 %v52_v1, %v2706_v50  ;;  %v2734_v37 = vand.u32 4294901760, %v50_v23  ;;  %115 = vst [vmem:[#allocation1 + $0x6] ss:$9 sm:$0xff] %v29_v43 }
  0x2c   :  { %472 = vmatpush.msrb.mxu2 %v2549_v53  ;;  %v547_v0 = vsub.f32 %v2651_v27, %v3791_v14  ;;  %v3792_v19 = vand.u32 4294901760, %v2394_v24  ;;  %531 = vmatpush.msrb.mxu3 %v530_v5  ;;  %v542_v40 = vand.u32 4294901760, %v541_v58  ;;  %v553_v1 = vsub.f32 %v2676_v22, %v552_v38  ;;  %117 = vst [vmem:[#allocation1 + $0x7] ss:$9 sm:$0xff] %v30_v32  ;;  %v48_v5 = vld [vmem:[%s3720_s1 + $0x88] sm:$0xff] }
  0x2d   :  { %380 = vmatpush.msrb.mxu0 %v3790_v61  ;;  %431 = vmatpush.msrb.mxu1 %v2335_v2  ;;  %v49_v2 = vld [vmem:[%s3720_s1 + $0x90] sm:$0xff]  ;;  %v564_v10 = vand.u32 4294901760, %v2719_v18  ;;  %v2748_v24 = vsub.f32 %v51_v26, %v2721_v13  ;;  %v559_v6 = vsub.f32 %v2704_v49, %v558_v47  ;;  %v570_v26 = vand.u32 4294901760, %v2732_v42 }
  0x2e   :  { %474 = vmatpush.msrb.mxu2 %v2559_v59  ;;  %v548_v30 = vand.u32 4294901760, %v547_v0  ;;  %537 = vmatpush.msrb.mxu3 %v536_v11  ;;  %v2761_v17 = vand.u32 4294901760, %v49_v2  ;;  %v554_v57 = vand.u32 4294901760, %v553_v1  ;;  %v2774_v43 = vand.u32 4294901760, %v48_v5 }
  0x2f   :  { %384 = vmatpush.msrb.mxu0 %v3792_v19  ;;  %433 = vmatpush.msrb.mxu1 %v2337_v3  ;;  %v3793_v3 = vand.u32 4294901760, %v2403_v28  ;;  %v2764_v28 = vsub.f32 %v50_v23, %v2734_v37  ;;  %v565_v33 = vsub.f32 %v2719_v18, %v564_v10  ;;  %v576_v58 = vand.u32 4294901760, %v2748_v24  ;;  %v47_v23 = vld [vmem:[%s3720_s1 + $0x80] sm:$0xff] }
  0x30   :  { %476 = vmatpush.msrb.mxu2 %v2576_v34  ;;  %543 = vmatpush.msrb.mxu3 %v542_v40  ;;  %v571_v32 = vsub.f32 %v2732_v42, %v570_v26  ;;  %v2788_v14 = vsub.f32 %v49_v2, %v2761_v17  ;;  %v3796_v0 = vand.u32 4294901760, %v2461_v52  ;;  %v2802_v2 = vsub.f32 %v48_v5, %v2774_v43 }
  0x31   :  { %388 = vmatpush.msrb.mxu0 %v3793_v3  ;;  %435 = vmatpush.msrb.mxu1 %v2348_v7  ;;  %v3794_v7 = vand.u32 4294901760, %v2426_v36  ;;  %v3795_v36 = vand.u32 4294901760, %v2446_v46  ;;  %v582_v61 = vand.u32 4294901760, %v2764_v28  ;;  %v566_v11 = vand.u32 4294901760, %v565_v33 }
  0x32   :  { %478 = vmatpush.msrb.mxu2 %v2594_v44  ;;  %549 = vmatpush.msrb.mxu3 %v548_v30  ;;  %v577_v19 = vsub.f32 %v2748_v24, %v576_v58  ;;  %v3797_v52 = vand.u32 4294901760, %v2469_v54  ;;  %v572_v1 = vand.u32 4294901760, %v571_v32  ;;  %v3798_v5 = vand.u32 4294901760, %v2497_v4 }
  0x33   :  { %392 = vmatpush.msrb.mxu0 %v3794_v7  ;;  %437 = vmatpush.msrb.mxu1 %v2350_v8  ;;  %v560_v8 = vand.u32 4294901760, %v559_v6  ;;  %v118_v46 = vld [vmem:[#allocation1] sm:$0xff]  ;;  %v583_v3 = vsub.f32 %v2764_v28, %v582_v61  ;;  %v588_v6 = vand.u32 4294901760, %v2788_v14 }
  0x34   :  { %480 = vmatpush.msrb.mxu2 %v2615_v62  ;;  %555 = vmatpush.msrb.mxu3 %v554_v57  ;;  %v2799_v40 = vand.u32 4294901760, %v118_v46  ;;  %v578_v54 = vand.u32 4294901760, %v577_v19  ;;  %v594_v57 = vand.u32 4294901760, %v2802_v2 }
  0x35   :  { %396 = vmatpush.msrb.mxu0 %v3795_v36  ;;  %439 = vmatpush.msrb.mxu1 %v2352_v9  ;;  %v2793_v9 = vand.u32 4294901760, %v47_v23  ;;  %v3799_v36 = vand.u32 4294901760, %v2512_v21 }
  0x36   :  { %482 = vmatpush.msrb.mxu2 %v2628_v12  ;;  %561 = vmatpush.msrb.mxu3 %v560_v8  ;;  %v159_v30 = vsub.f32 %v118_v46, %v2799_v40  ;;  %v3800_v8 = vand.u32 4294901760, %v2531_v39  ;;  %v595_v21 = vsub.f32 %v2802_v2, %v594_v57  ;;  %v3801_v46 = vand.u32 4294901760, %v2542_v45 }
  0x37   :  { %400 = vmatpush.msrb.mxu0 %v3796_v0  ;;  %441 = vmatpush.msrb.mxu1 %v2371_v15  ;;  %v119_v15 = vld [vmem:[#allocation1 + $0x9] sm:$0xff]  ;;  %v3802_v39 = vand.u32 4294901760, %v2567_v63 }
  0x38   :  { %484 = vmatpush.msrb.mxu2 %v2663_v60  ;;  %567 = vmatpush.msrb.mxu3 %v566_v11  ;;  %v160_v7 = vand.u32 4294901760, %v159_v30  ;;  %v2821_v33 = vand.u32 4294901760, %v119_v15  ;;  %v596_v45 = vand.u32 4294901760, %v595_v21  ;;  %v3804_v63 = vld [vmem:[#allocation9_spill] sm:$0xff] }
  0x39   :  { %404 = vmatpush.msrb.mxu0 %v3797_v52  ;;  %443 = vmatpush.msrb.mxu1 %v2373_v16  ;;  %v2817_v16 = vsub.f32 %v47_v23, %v2793_v9  ;;  %v589_v23 = vsub.f32 %v2788_v14, %v588_v6  ;;  %v3805_v52 = vld [vmem:[#allocation6_spill] sm:$0xff] }
  0x3a   :  { %486 = vmatpush.msrb.mxu2 %v2685_v55  ;;  %573 = vmatpush.msrb.mxu3 %v572_v1  ;;  %v161_v4 = vsub.f32 %v159_v30, %v160_v7  ;;  %v2839_v0 = vsub.f32 %v119_v15, %v2821_v33  ;;  %v3806_v1 = vld [vmem:[#allocation10_spill] sm:$0xff] }
  0x3b   :  { %408 = vmatpush.msrb.mxu0 %v3798_v5  ;;  %445 = vmatpush.msrb.mxu1 %v2384_v20  ;;  %v584_v20 = vand.u32 4294901760, %v583_v3  ;;  %v600_v32 = vand.u32 4294901760, %v2817_v16  ;;  %v3807_v3 = vand.u32 4294901760, %v2545_v48  ;;  %v3808_v5 = vld [vmem:[#allocation7_spill] sm:$0xff] }
  0x3c   :  { %488 = vmatpush.msrb.mxu2 %v2706_v50  ;;  %579 = vmatpush.msrb.mxu3 %v578_v54  ;;  %v501_v19 = vand.u32 4294901760, %v2839_v0  ;;  %v3810_v54 = vand.u32 4294901760, %v3804_v63 }
  0x3d   :  { %412 = vmatpush.msrb.mxu0 %v3799_v36  ;;  %447 = vmatpush.msrb.mxu1 %v2413_v31  ;;  %v162_v31 = vand.u32 4294901760, %v161_v4  ;;  %v601_v11 = vsub.f32 %v2817_v16, %v600_v32 }
  0x3e   :  { %490 = vmatpush.msrb.mxu2 %v2721_v13  ;;  %585 = vmatpush.msrb.mxu3 %v584_v20  ;;  %v502_v15 = vsub.f32 %v2839_v0, %v501_v19  ;;  %v3811_v20 = vld [vmem:[#allocation8_spill] sm:$0xff] }
  0x3f   :  { %416 = vmatpush.msrb.mxu0 %v3800_v8  ;;  %449 = vmatpush.msrb.mxu1 %v2423_v35  ;;  %v590_v35 = vand.u32 4294901760, %v589_v23 }
  0x40   :  { %492 = vmatpush.msrb.mxu2 %v2734_v37  ;;  %163 = vmatmul.f32.vlgmr.msra.gmra.mxu0 %v162_v31  ;;  %v503_v36 = vand.u32 4294901760, %v502_v15 }
  0x41   :  { %420 = vmatpush.msrb.mxu0 %v3801_v46  ;;  %451 = vmatpush.msrb.mxu1 %v2435_v41  ;;  %v3803_v41 = vld [vmem:[#allocation5_spill] sm:$0xff] }
  0x42   :  { %494 = vmatpush.msrb.mxu2 %v2761_v17  ;;  %591 = vmatpush.msrb.mxu3 %v590_v35 }
  0x43   :  { %424 = vmatpush.msrb.mxu0 %v3802_v39  ;;  %453 = vmatpush.msrb.mxu1 %v2458_v51  ;;  %v602_v51 = vand.u32 4294901760, %v601_v11  ;;  %v67_v11 = vld [vmem:[%s3720_s1 + $0x120] sm:$0xff] }
  0x44   :  { %496 = vmatpush.msrb.mxu2 %v2774_v43  ;;  %597 = vmatpush.msrb.mxu3 %v596_v45 }
  0x45   :  { %611 = vmatpush.msra.mxu0 %v2545_v48  ;;  %455 = vmatpush.msrb.mxu1 %v3803_v41  ;;  %v3813_v48 = vand.u32 4294901760, %v3806_v1 }
  0x46   :  { %318 = vmatmul.f32.vlgmr.msra.gmra.mxu2 %v159_v30  ;;  %357 = vmatmul.f32.vlgmr.msra.gmra.mxu3 %v160_v7  ;;  %v3809_v30 = vld [vmem:[#allocation11_spill] sm:$0xff]  ;;  %v3812_v7 = vld [vmem:[#allocation12_spill] sm:$0xff] }
  0x47   :  { %614 = vmatpush.msra.mxu0 %v3804_v63  ;;  %457 = vmatpush.msrb.mxu1 %v3805_v52  ;;  %v3814_v4 = vand.u32 4294901760, %v3809_v30 }
  0x48   :  { %498 = vmatpush.msrb.mxu2 %v2793_v9  ;;  %603 = vmatpush.msrb.mxu3 %v602_v51  ;;  %v66_v51 = vld [vmem:[%s3720_s1 + $0x118] sm:$0xff] }
  0x49   :  { %617 = vmatpush.msra.mxu0 %v3806_v1  ;;  %459 = vmatpush.msrb.mxu1 %v3808_v5  ;;  %v3076_v1 = vand.u32 4294901760, %v67_v11 }
  0x4a   :  { %705 = vmatpush.msra.mxu2 %v3807_v3  ;;  %264 = vmatmul.f32.vlgmr.msra.gmra.mxu1 %v2799_v40 }
  0x4b   :  { %620 = vmatpush.msra.mxu0 %v3809_v30  ;;  %772 = vmatpush.msra.mxu3 %v2514_v25 }
  0x4c   :  { %709 = vmatpush.msra.mxu2 %v3810_v54  ;;  %461 = vmatpush.msrb.mxu1 %v3811_v20  ;;  %v65_v54 = vld [vmem:[%s3720_s1 + $0x110] sm:$0xff] }
  0x4d   :  { %623 = vmatpush.msra.mxu0 %v3812_v7  ;;  %774 = vmatpush.msra.mxu3 %v2516_v29 }
  0x4e   :  { %664 = vmatpush.msra.mxu1 %v2514_v25  ;;  %713 = vmatpush.msra.mxu2 %v3813_v48  ;;  %v3815_v25 = vand.u32 4294901760, %v3812_v7  ;;  %v3093_v7 = vand.u32 4294901760, %v66_v51 }
  0x4f   :  { %504 = vmatmul.f32.vlgmr.msrb.gmra.mxu2 %v503_v36  ;;  %626 = vmatpush.msra.mxu0 %v2626_v56 }
  0x50   :  { %666 = vmatpush.msra.mxu1 %v2516_v29  ;;  %717 = vmatpush.msra.mxu2 %v3814_v4  ;;  %v3816_v29 = vand.u32 4294901760, %v2626_v56 }
  0x51   :  { %776 = vmatpush.msra.mxu3 %v2549_v53  ;;  %426 = vmatmul.f32.vlgmr.msrb.gmra.mxu0 %v2799_v40 }
  0x52   :  { %605 = vmatmul.f32.vlgmr.msrb.gmra.mxu3 %v2821_v33  ;;  %629 = vmatpush.msra.mxu0 %v2651_v27 }
  0x53   :  { %668 = vmatpush.msra.mxu1 %v2549_v53  ;;  %721 = vmatpush.msra.mxu2 %v3815_v25  ;;  %v3817_v53 = vand.u32 4294901760, %v2651_v27  ;;  %v78_v27 = vld [vmem:[%s3720_s1 + $0x178] sm:$0xff] }
  0x54   :  { %778 = vmatpush.msra.mxu3 %v2559_v59  ;;  %463 = vmatmul.f32.vlgmr.msrb.gmra.mxu1 %v2799_v40 }
  0x55   :  { %632 = vmatpush.msra.mxu0 %v2676_v22  ;;  %670 = vmatpush.msra.mxu1 %v2559_v59  ;;  %v77_v59 = vld [vmem:[%s3720_s1 + $0x170] sm:$0xff]  ;;  %v74_v22 = vld [vmem:[%s3720_s1 + $0x158] sm:$0xff] }
  0x56   :  { %725 = vmatpush.msra.mxu2 %v3816_v29  ;;  %780 = vmatpush.msra.mxu3 %v2576_v34 }
  0x57   :  { %635 = vmatpush.msra.mxu0 %v2704_v49  ;;  %672 = vmatpush.msra.mxu1 %v2576_v34  ;;  %v76_v34 = vld [vmem:[%s3720_s1 + $0x168] sm:$0xff] }
  0x58   :  { %729 = vmatpush.msra.mxu2 %v3817_v53  ;;  %782 = vmatpush.msra.mxu3 %v2594_v44  ;;  %v2940_v56 = vand.u32 4294901760, %v76_v34  ;;  %v3105_v53 = vand.u32 4294901760, %v65_v54 }
  0x59   :  { %638 = vmatpush.msra.mxu0 %v2719_v18  ;;  %674 = vmatpush.msra.mxu1 %v2594_v44  ;;  %v75_v44 = vld [vmem:[%s3720_s1 + $0x160] sm:$0xff]  ;;  %v2963_v18 = vand.u32 4294901760, %v74_v22 }
  0x5a   :  { %733 = vmatpush.msra.mxu2 %v552_v38  ;;  %784 = vmatpush.msra.mxu3 %v2615_v62  ;;  %v73_v38 = vld [vmem:[%s3720_s1 + $0x150] sm:$0xff] }
  0x5b   :  { %641 = vmatpush.msra.mxu0 %v2732_v42  ;;  %676 = vmatpush.msra.mxu1 %v2615_v62  ;;  %v2920_v62 = vand.u32 4294901760, %v78_v27  ;;  %v2974_v42 = vand.u32 4294901760, %v73_v38 }
  0x5c   :  { %737 = vmatpush.msra.mxu2 %v558_v47  ;;  %786 = vmatpush.msra.mxu3 %v2628_v12  ;;  %v2970_v47 = vsub.f32 %v76_v34, %v2940_v56  ;;  %v64_v34 = vld [vmem:[%s3720_s1 + $0x108] sm:$0xff] }
  0x5d   :  { %644 = vmatpush.msra.mxu0 %v2748_v24  ;;  %678 = vmatpush.msra.mxu1 %v2628_v12  ;;  %v2930_v12 = vand.u32 4294901760, %v77_v59 }
  0x5e   :  { %741 = vmatpush.msra.mxu2 %v564_v10  ;;  %788 = vmatpush.msra.mxu3 %v2663_v60 }
  0x5f   :  { %647 = vmatpush.msra.mxu0 %v2764_v28  ;;  %680 = vmatpush.msra.mxu1 %v2663_v60  ;;  %v2943_v60 = vsub.f32 %v78_v27, %v2920_v62  ;;  %v2956_v49 = vsub.f32 %v77_v59, %v2930_v12  ;;  %v3109_v59 = vsub.f32 %v67_v11, %v3076_v1 }
  0x60   :  { %745 = vmatpush.msra.mxu2 %v570_v26  ;;  %790 = vmatpush.msra.mxu3 %v2685_v55  ;;  %v71_v26 = vld [vmem:[%s3720_s1 + $0x140] sm:$0xff] }
  0x61   :  { %650 = vmatpush.msra.mxu0 %v2788_v14  ;;  %682 = vmatpush.msra.mxu1 %v2685_v55  ;;  %v2953_v55 = vand.u32 4294901760, %v75_v44  ;;  %v857_v10 = vand.u32 4294901760, %v2956_v49  ;;  %v70_v14 = vld [vmem:[%s3720_s1 + $0x138] sm:$0xff] }
  0x62   :  { %749 = vmatpush.msra.mxu2 %v576_v58  ;;  %792 = vmatpush.msra.mxu3 %v2706_v50 }
  0x63   :  { %653 = vmatpush.msra.mxu0 %v2802_v2  ;;  %684 = vmatpush.msra.mxu1 %v2706_v50  ;;  %v851_v50 = vand.u32 4294901760, %v2943_v60  ;;  %v2984_v24 = vsub.f32 %v75_v44, %v2953_v55  ;;  %v858_v40 = vsub.f32 %v2956_v49, %v857_v10  ;;  %v3016_v2 = vand.u32 4294901760, %v71_v26 }
  0x64   :  { %753 = vmatpush.msra.mxu2 %v582_v61  ;;  %794 = vmatpush.msra.mxu3 %v2721_v13  ;;  %v3006_v61 = vsub.f32 %v73_v38, %v2974_v42 }
  0x65   :  { %656 = vmatpush.msra.mxu0 %v2817_v16  ;;  %686 = vmatpush.msra.mxu1 %v2721_v13  ;;  %v72_v13 = vld [vmem:[%s3720_s1 + $0x148] sm:$0xff]  ;;  %v852_v28 = vsub.f32 %v2943_v60, %v851_v50  ;;  %v859_v21 = vand.u32 4294901760, %v858_v40  ;;  %v3049_v39 = vsub.f32 %v71_v26, %v3016_v2  ;;  %v3125_v26 = vsub.f32 %v66_v51, %v3093_v7  ;;  %v63_v40 = vld [vmem:[%s3720_s1 + $0x100] sm:$0xff] }
  0x66   :  { %757 = vmatpush.msra.mxu2 %v588_v6  ;;  %796 = vmatpush.msra.mxu3 %v2734_v37  ;;  %v3000_v58 = vand.u32 4294901760, %v72_v13  ;;  %v3765_v6 = vand.u32 4294901760, %v2984_v24  ;;  %v3760_v31 = vand.u32 4294901760, %v3006_v61 }
  0x67   :  { %659 = vmatmul.f32.vlgmr.msra.gmra.mxu0 %v2839_v0  ;;  %688 = vmatpush.msra.mxu1 %v2734_v37  ;;  %v2989_v37 = vsub.f32 %v74_v22, %v2963_v18  ;;  %v853_v23 = vand.u32 4294901760, %v852_v28  ;;  %v3757_v3 = vand.u32 4294901760, %v3049_v39  ;;  %v94_v28 = vld [vmem:[%s3720_s1 + $0x1f8] sm:$0xff] }
  0x68   :  { %809 = vmatpush.msrb.mxu0 %v2920_v62  ;;  %761 = vmatpush.msra.mxu2 %v594_v57  ;;  %v69_v57 = vld [vmem:[%s3720_s1 + $0x130] sm:$0xff]  ;;  %v870_v46 = vsub.f32 %v2984_v24, %v3765_v6  ;;  %v882_v52 = vsub.f32 %v3006_v61, %v3760_v31 }
  0x69   :  { %798 = vmatpush.msra.mxu3 %v2761_v17  ;;  %690 = vmatpush.msra.mxu1 %v2761_v17  ;;  %v863_v17 = vand.u32 4294901760, %v2970_v47  ;;  %v3762_v16 = vand.u32 4294901760, %v2989_v37  ;;  %v3046_v35 = vand.u32 4294901760, %v69_v57  ;;  %v894_v29 = vsub.f32 %v3049_v39, %v3757_v3 }
  0x6a   :  { %811 = vmatpush.msrb.mxu0 %v2930_v12  ;;  %765 = vmatpush.msra.mxu2 %v600_v32  ;;  %v3030_v32 = vand.u32 4294901760, %v70_v14  ;;  %v871_v15 = vand.u32 4294901760, %v870_v46  ;;  %v883_v25 = vand.u32 4294901760, %v882_v52  ;;  %v3148_v46 = vand.u32 4294901760, %v94_v28 }
  0x6b   :  { %800 = vmatpush.msra.mxu3 %v2774_v43  ;;  %767 = vmatmul.f32.vlgmr.msra.gmra.mxu2 %v2821_v33  ;;  %v864_v8 = vsub.f32 %v2970_v47, %v863_v17  ;;  %v3080_v5 = vsub.f32 %v69_v57, %v3046_v35  ;;  %v895_v57 = vand.u32 4294901760, %v894_v29  ;;  %v3754_v52 = vand.u32 4294901760, %v3125_v26  ;;  %v91_v29 = vld [vmem:[%s3720_s1 + $0x1e0] sm:$0xff] }
  0x6c   :  { %813 = vmatpush.msrb.mxu0 %v2940_v56  ;;  %952 = vmatpush.msrb.mxu2 %v2943_v60  ;;  %v3065_v0 = vsub.f32 %v70_v14, %v3030_v32  ;;  %v3132_v14 = vand.u32 4294901760, %v64_v34  ;;  %v86_v60 = vld [vmem:[%s3720_s1 + $0x1b8] sm:$0xff] }
  0x6d   :  { %692 = vmatpush.msra.mxu1 %v2774_v43  ;;  %802 = vmatpush.msra.mxu3 %v2793_v9  ;;  %v3033_v43 = vsub.f32 %v72_v13, %v3000_v58  ;;  %v865_v45 = vand.u32 4294901760, %v864_v8  ;;  %v3755_v27 = vand.u32 4294901760, %v3080_v5  ;;  %v3752_v8 = vand.u32 4294901760, %v3109_v59 }
  0x6e   :  { %804 = vmatmul.f32.vlgmr.msra.gmra.mxu3 %v2821_v33  ;;  %815 = vmatpush.msrb.mxu0 %v2953_v55  ;;  %v68_v33 = vld [vmem:[%s3720_s1 + $0x128] sm:$0xff]  ;;  %v3756_v48 = vand.u32 4294901760, %v3065_v0  ;;  %v3163_v51 = vsub.f32 %v64_v34, %v3132_v14 }
  0x6f   :  { %955 = vmatpush.msrb.mxu2 %v2956_v49  ;;  %1005 = vmatpush.msrb.mxu3 %v2920_v62  ;;  %v3061_v41 = vand.u32 4294901760, %v68_v33  ;;  %v3759_v63 = vand.u32 4294901760, %v3033_v43  ;;  %v85_v49 = vld [vmem:[%s3720_s1 + $0x1b0] sm:$0xff] }
  0x70   :  { %694 = vmatpush.msra.mxu1 %v2793_v9  ;;  %817 = vmatpush.msrb.mxu0 %v2963_v18  ;;  %v876_v9 = vsub.f32 %v2989_v37, %v3762_v16  ;;  %v900_v38 = vsub.f32 %v3065_v0, %v3756_v48 }
  0x71   :  { %698 = vmatmul.f32.vlgmr.msra.gmra.mxu1 %v501_v19  ;;  %958 = vmatpush.msrb.mxu2 %v2970_v47  ;;  %v120_v19 = vld [vmem:[#allocation1 + $0x12] sm:$0xff]  ;;  %v888_v20 = vsub.f32 %v3033_v43, %v3759_v63  ;;  %v3097_v4 = vsub.f32 %v68_v33, %v3061_v41  ;;  %v3143_v33 = vsub.f32 %v65_v54, %v3105_v53 }
  0x72   :  { %854 = vmatpush.msrb.mxu1 %v853_v23  ;;  %1007 = vmatpush.msrb.mxu3 %v2930_v12  ;;  %v877_v30 = vand.u32 4294901760, %v876_v9  ;;  %v3087_v36 = vand.u32 4294901760, %v120_v19  ;;  %v906_v23 = vsub.f32 %v3080_v5, %v3755_v27  ;;  %v93_v9 = vld [vmem:[%s3720_s1 + $0x1f0] sm:$0xff]  ;;  %v901_v11 = vand.u32 4294901760, %v900_v38 }
  0x73   :  { %819 = vmatpush.msrb.mxu0 %v2974_v42  ;;  %961 = vmatpush.msrb.mxu2 %v2984_v24  ;;  %v889_v22 = vand.u32 4294901760, %v888_v20  ;;  %v3753_v13 = vand.u32 4294901760, %v3097_v4  ;;  %v918_v54 = vsub.f32 %v3109_v59, %v3752_v8  ;;  %v3758_v20 = vand.u32 4294901760, %v3143_v33 }
  0x74   :  { %860 = vmatpush.msrb.mxu1 %v859_v21  ;;  %1009 = vmatpush.msrb.mxu3 %v2940_v56  ;;  %v3117_v44 = vsub.f32 %v120_v19, %v3087_v36  ;;  %v3157_v19 = vand.u32 4294901760, %v63_v40 }
  0x75   :  { %821 = vmatpush.msrb.mxu0 %v3000_v58  ;;  %964 = vmatpush.msrb.mxu2 %v2989_v37 }
  0x76   :  { %866 = vmatpush.msrb.mxu1 %v865_v45  ;;  %1011 = vmatpush.msrb.mxu3 %v2953_v55  ;;  %v842_v21 = vand.u32 4294901760, %v3117_v44  ;;  %v912_v45 = vsub.f32 %v3097_v4, %v3753_v13  ;;  %v90_v13 = vld [vmem:[%s3720_s1 + $0x1d8] sm:$0xff] }
  0x77   :  { %823 = vmatpush.msrb.mxu0 %v3016_v2  ;;  %967 = vmatpush.msrb.mxu2 %v3006_v61  ;;  %v3213_v3 = vand.u32 4294901760, %v90_v13 }
  0x78   :  { %872 = vmatpush.msrb.mxu1 %v871_v15  ;;  %1013 = vmatpush.msrb.mxu3 %v2963_v18  ;;  %v92_v15 = vld [vmem:[%s3720_s1 + $0x1e8] sm:$0xff]  ;;  %v843_v34 = vsub.f32 %v3117_v44, %v842_v21  ;;  %v913_v38 = vand.u32 4294901760, %v912_v45  ;;  %v919_v45 = vand.u32 4294901760, %v918_v54 }
  0x79   :  { %825 = vmatpush.msrb.mxu0 %v3030_v32  ;;  %970 = vmatpush.msrb.mxu2 %v3033_v43  ;;  %v3193_v8 = vand.u32 4294901760, %v92_v15 }
  0x7a   :  { %878 = vmatpush.msrb.mxu1 %v877_v30  ;;  %1015 = vmatpush.msrb.mxu3 %v2974_v42  ;;  %v907_v30 = vand.u32 4294901760, %v906_v23  ;;  %v3191_v23 = vsub.f32 %v63_v40, %v3157_v19  ;;  %v930_v40 = vsub.f32 %v3143_v33, %v3758_v20  ;;  %v844_v27 = vand.u32 4294901760, %v843_v34 }
  0x7b   :  { %827 = vmatpush.msrb.mxu0 %v3046_v35  ;;  %973 = vmatpush.msrb.mxu2 %v3049_v39  ;;  %v3221_v20 = vsub.f32 %v92_v15, %v3193_v8 }
  0x7c   :  { %884 = vmatpush.msrb.mxu1 %v883_v25  ;;  %1017 = vmatpush.msrb.mxu3 %v3000_v58  ;;  %v3173_v25 = vand.u32 4294901760, %v93_v9  ;;  %v931_v15 = vand.u32 4294901760, %v930_v40 }
  0x7d   :  { %829 = vmatpush.msrb.mxu0 %v3061_v41  ;;  %976 = vmatpush.msrb.mxu2 %v3065_v0  ;;  %v3766_v40 = vand.u32 4294901760, %v3221_v20 }
  0x7e   :  { %890 = vmatpush.msrb.mxu1 %v889_v22  ;;  %1019 = vmatpush.msrb.mxu3 %v3016_v2  ;;  %v3184_v22 = vsub.f32 %v94_v28, %v3148_v46  ;;  %v3761_v28 = vand.u32 4294901760, %v3163_v51 }
  0x7f   :  { %831 = vmatpush.msrb.mxu0 %v3076_v1  ;;  %979 = vmatpush.msrb.mxu2 %v3080_v5 }
  0x80   :  { %896 = vmatpush.msrb.mxu1 %v895_v57  ;;  %1021 = vmatpush.msrb.mxu3 %v3030_v32  ;;  %v924_v57 = vsub.f32 %v3125_v26, %v3754_v52  ;;  %v3208_v52 = vsub.f32 %v93_v9, %v3173_v25  ;;  %v3763_v48 = vand.u32 4294901760, %v3184_v22  ;;  %v3764_v9 = vand.u32 4294901760, %v3191_v23 }
  0x81   :  { %833 = vmatpush.msrb.mxu0 %v3093_v7  ;;  %982 = vmatpush.msrb.mxu2 %v3097_v4  ;;  %v936_v34 = vsub.f32 %v3163_v51, %v3761_v28  ;;  %v3243_v28 = vsub.f32 %v90_v13, %v3213_v3 }
  0x82   :  { %902 = vmatpush.msrb.mxu1 %v901_v11  ;;  %1023 = vmatpush.msrb.mxu3 %v3046_v35  ;;  %v3201_v11 = vand.u32 4294901760, %v91_v29  ;;  %v925_v54 = vand.u32 4294901760, %v924_v57  ;;  %v3767_v57 = vand.u32 4294901760, %v3208_v52 }
  0x83   :  { %835 = vmatpush.msrb.mxu0 %v3105_v53  ;;  %985 = vmatpush.msrb.mxu2 %v3109_v59  ;;  %v937_v13 = vand.u32 4294901760, %v936_v34  ;;  %v3769_v6 = vand.u32 4294901760, %v3243_v28 }
  0x84   :  { %908 = vmatpush.msrb.mxu1 %v907_v30  ;;  %1025 = vmatpush.msrb.mxu3 %v3061_v41  ;;  %v89_v30 = vld [vmem:[%s3720_s1 + $0x1d0] sm:$0xff]  ;;  %v3229_v63 = vsub.f32 %v91_v29, %v3201_v11  ;;  %v1193_v29 = vsub.f32 %v3184_v22, %v3763_v48 }
  0x85   :  { %837 = vmatpush.msrb.mxu0 %v3132_v14  ;;  %988 = vmatpush.msrb.mxu2 %v3125_v26  ;;  %v3236_v31 = vand.u32 4294901760, %v89_v30 }
  0x86   :  { %914 = vmatpush.msrb.mxu1 %v913_v38  ;;  %1027 = vmatpush.msrb.mxu3 %v3076_v1  ;;  %v88_v38 = vld [vmem:[%s3720_s1 + $0x1c8] sm:$0xff]  ;;  %v3768_v48 = vand.u32 4294901760, %v3229_v63  ;;  %v1194_v34 = vand.u32 4294901760, %v1193_v29  ;;  %v3287_v29 = vand.u32 4294901760, %v86_v60 }
  0x87   :  { %839 = vmatpush.msrb.mxu0 %v3157_v19  ;;  %991 = vmatpush.msrb.mxu2 %v3143_v33  ;;  %v3254_v16 = vand.u32 4294901760, %v88_v38 }
  0x88   :  { %920 = vmatpush.msrb.mxu1 %v919_v45  ;;  %1029 = vmatpush.msrb.mxu3 %v3093_v7  ;;  %v87_v45 = vld [vmem:[%s3720_s1 + $0x1c0] sm:$0xff]  ;;  %v1211_v47 = vsub.f32 %v3229_v63, %v3768_v48  ;;  %v1217_v48 = vsub.f32 %v3243_v28, %v3769_v6 }
  0x89   :  { %845 = vmatmul.f32.vlgmr.msrb.gmra.mxu0 %v844_v27  ;;  %994 = vmatpush.msrb.mxu2 %v3163_v51  ;;  %v942_v27 = vsub.f32 %v3191_v23, %v3764_v9  ;;  %v3270_v9 = vand.u32 4294901760, %v87_v45 }
  0x8a   :  { %1046 = vmatpush.msra.mxu0 %v851_v50  ;;  %926 = vmatpush.msrb.mxu1 %v925_v54  ;;  %v1199_v50 = vsub.f32 %v3208_v52, %v3767_v57  ;;  %v3268_v54 = vsub.f32 %v89_v30, %v3236_v31  ;;  %v1205_v30 = vsub.f32 %v3221_v20, %v3766_v40  ;;  %v3304_v57 = vand.u32 4294901760, %v85_v49 }
  0x8b   :  { %1031 = vmatpush.msrb.mxu3 %v3105_v53  ;;  %997 = vmatpush.msrb.mxu2 %v3191_v23  ;;  %v1218_v6 = vand.u32 4294901760, %v1217_v48  ;;  %v3821_v48 = vand.u32 4294901760, %v3033_v43  ;;  %v80_v43 = vld [vmem:[%s3720_s1 + $0x188] sm:$0xff] }
  0x8c   :  { %1050 = vmatpush.msra.mxu0 %v857_v10  ;;  %932 = vmatpush.msrb.mxu1 %v931_v15  ;;  %v943_v10 = vand.u32 4294901760, %v942_v27  ;;  %v3285_v15 = vsub.f32 %v88_v38, %v3254_v16  ;;  %v3818_v27 = vand.u32 4294901760, %v2984_v24  ;;  %v1200_v38 = vand.u32 4294901760, %v1199_v50  ;;  %v83_v24 = vld [vmem:[%s3720_s1 + $0x1a0] sm:$0xff] }
  0x8d   :  { %1033 = vmatpush.msrb.mxu3 %v3132_v14  ;;  %1000 = vmatmul.f32.vlgmr.msrb.gmra.mxu2 %v3117_v44  ;;  %v3770_v40 = vand.u32 4294901760, %v3268_v54  ;;  %v3819_v44 = vand.u32 4294901760, %v2989_v37  ;;  %v3317_v50 = vsub.f32 %v86_v60, %v3287_v29 }
  0x8e   :  { %1054 = vmatpush.msra.mxu0 %v863_v17  ;;  %1150 = vmatpush.msra.mxu2 %v3148_v46  ;;  %v84_v17 = vld [vmem:[%s3720_s1 + $0x1a8] sm:$0xff] }
  0x8f   :  { %938 = vmatpush.msrb.mxu1 %v937_v13  ;;  %1035 = vmatpush.msrb.mxu3 %v3157_v19  ;;  %v3302_v13 = vsub.f32 %v87_v45, %v3270_v9  ;;  %v3771_v45 = vand.u32 4294901760, %v3285_v15  ;;  %v1223_v37 = vsub.f32 %v3268_v54, %v3770_v40 }
  0x90   :  { %1039 = vmatmul.f32.vlgmr.msrb.gmra.mxu3 %v842_v21  ;;  %1058 = vmatpush.msra.mxu0 %v3818_v27  ;;  %v1206_v21 = vand.u32 4294901760, %v1205_v30  ;;  %v3319_v27 = vand.u32 4294901760, %v84_v17  ;;  %v3332_v30 = vsub.f32 %v85_v49, %v3304_v57 }
  0x91   :  { %1152 = vmatpush.msra.mxu2 %v3173_v25  ;;  %1195 = vmatpush.msra.mxu3 %v1194_v34  ;;  %v1212_v34 = vand.u32 4294901760, %v1211_v47  ;;  %v3772_v60 = vand.u32 4294901760, %v3302_v13  ;;  %v3820_v47 = vand.u32 4294901760, %v3006_v61  ;;  %v81_v61 = vld [vmem:[%s3720_s1 + $0x190] sm:$0xff] }
  0x92   :  { %944 = vmatpush.msrb.mxu1 %v943_v10  ;;  %1062 = vmatpush.msra.mxu0 %v3819_v44  ;;  %v82_v10 = vld [vmem:[%s3720_s1 + $0x198] sm:$0xff]  ;;  %v3334_v44 = vand.u32 4294901760, %v83_v24  ;;  %v3345_v49 = vsub.f32 %v84_v17, %v3319_v27 }
  0x93   :  { %946 = vmatmul.f32.vlgmr.msrb.gmra.mxu1 %v3087_v36  ;;  %1154 = vmatpush.msra.mxu2 %v3193_v8  ;;  %v3347_v40 = vand.u32 4294901760, %v82_v10  ;;  %v1235_v17 = vsub.f32 %v3302_v13, %v3772_v60 }
  0x94   :  { %1113 = vmatpush.msra.mxu1 %v2920_v62  ;;  %1201 = vmatpush.msra.mxu3 %v1200_v38  ;;  %v1229_v62 = vsub.f32 %v3285_v15, %v3771_v45  ;;  %v3773_v38 = vand.u32 4294901760, %v3317_v50  ;;  %v3822_v45 = vand.u32 4294901760, %v3049_v39  ;;  %v79_v39 = vld [vmem:[%s3720_s1 + $0x180] sm:$0xff] }
  0x95   :  { %1066 = vmatpush.msra.mxu0 %v3820_v47  ;;  %1156 = vmatpush.msra.mxu2 %v3201_v11  ;;  %v3361_v47 = vsub.f32 %v83_v24, %v3334_v44  ;;  %v3377_v60 = vsub.f32 %v82_v10, %v3347_v40 }
  0x96   :  { %1115 = vmatpush.msra.mxu1 %v2930_v12  ;;  %1207 = vmatpush.msra.mxu3 %v1206_v21  ;;  %v1224_v12 = vand.u32 4294901760, %v1223_v37  ;;  %v3774_v21 = vand.u32 4294901760, %v3332_v30  ;;  %v1241_v24 = vsub.f32 %v3317_v50, %v3773_v38  ;;  %v3824_v37 = vand.u32 4294901760, %v3080_v5 }
  0x97   :  { %1070 = vmatpush.msra.mxu0 %v3821_v48  ;;  %1158 = vmatpush.msra.mxu2 %v3213_v3  ;;  %v121_v48 = vld [vmem:[#allocation1 + $0x1b] sm:$0xff]  ;;  %v1258_v38 = vand.u32 4294901760, %v3361_v47  ;;  %v3826_v5 = vand.u32 4294901760, %v3097_v4 }
  0x98   :  { %1117 = vmatpush.msra.mxu1 %v2940_v56  ;;  %1213 = vmatpush.msra.mxu3 %v1212_v34  ;;  %v3369_v56 = vand.u32 4294901760, %v81_v61  ;;  %v1230_v34 = vand.u32 4294901760, %v1229_v62  ;;  %v1236_v62 = vand.u32 4294901760, %v1235_v17  ;;  %v1247_v10 = vsub.f32 %v3332_v30, %v3774_v21 }
  0x99   :  { %1074 = vmatpush.msra.mxu0 %v3822_v45  ;;  %1160 = vmatpush.msra.mxu2 %v3236_v31  ;;  %v3823_v45 = vand.u32 4294901760, %v3065_v0  ;;  %v1264_v21 = vand.u32 4294901760, %v3377_v60 }
  0x9a   :  { %1119 = vmatpush.msra.mxu1 %v2953_v55  ;;  %1219 = vmatpush.msra.mxu3 %v1218_v6  ;;  %v3385_v55 = vand.u32 4294901760, %v80_v43  ;;  %v3387_v6 = vand.u32 4294901760, %v121_v48  ;;  %v3398_v0 = vsub.f32 %v81_v61, %v3369_v56 }
  0x9b   :  { %1078 = vmatpush.msra.mxu0 %v3823_v45  ;;  %1162 = vmatpush.msra.mxu2 %v3254_v16  ;;  %v3400_v45 = vand.u32 4294901760, %v79_v39 }
  0x9c   :  { %1121 = vmatpush.msra.mxu1 %v2963_v18  ;;  %1225 = vmatpush.msra.mxu3 %v1224_v12  ;;  %v1242_v18 = vand.u32 4294901760, %v1241_v24  ;;  %v3825_v12 = vand.u32 4294901760, %v3345_v49  ;;  %v3411_v61 = vsub.f32 %v80_v43, %v3385_v55  ;;  %v3827_v24 = vand.u32 4294901760, %v3109_v59 }
  0x9d   :  { %1082 = vmatpush.msra.mxu0 %v3824_v37  ;;  %1164 = vmatpush.msra.mxu2 %v3270_v9  ;;  %v3414_v37 = vsub.f32 %v121_v48, %v3387_v6  ;;  %v1270_v4 = vand.u32 4294901760, %v3398_v0  ;;  %v3425_v43 = vsub.f32 %v79_v39, %v3400_v45  ;;  %v1265_v48 = vsub.f32 %v3377_v60, %v1264_v21 }
  0x9e   :  { %1123 = vmatpush.msra.mxu1 %v2974_v42  ;;  %1231 = vmatpush.msra.mxu3 %v1230_v34  ;;  %v1253_v17 = vsub.f32 %v3345_v49, %v3825_v12  ;;  %v1248_v42 = vand.u32 4294901760, %v1247_v10  ;;  %v1259_v34 = vsub.f32 %v3361_v47, %v1258_v38  ;;  %v1276_v59 = vand.u32 4294901760, %v3411_v61 }
  0x9f   :  { %1086 = vmatpush.msra.mxu0 %v3826_v5  ;;  %1166 = vmatpush.msra.mxu2 %v3287_v29  ;;  %v1183_v10 = vand.u32 4294901760, %v3414_v37  ;;  %v1266_v12 = vand.u32 4294901760, %v1265_v48 }
  0xa0   :  { %1125 = vmatpush.msra.mxu1 %v3000_v58  ;;  %1237 = vmatpush.msra.mxu3 %v1236_v62  ;;  %v1254_v58 = vand.u32 4294901760, %v1253_v17  ;;  %v3828_v62 = vand.u32 4294901760, %v3125_v26  ;;  %v1260_v39 = vand.u32 4294901760, %v1259_v34  ;;  %v1271_v26 = vsub.f32 %v3398_v0, %v1270_v4 }
  0xa1   :  { %1090 = vmatpush.msra.mxu0 %v3827_v24  ;;  %1168 = vmatpush.msra.mxu2 %v3304_v57  ;;  %v3830_v17 = vand.u32 4294901760, %v3163_v51 }
  0xa2   :  { %1127 = vmatpush.msra.mxu1 %v3016_v2  ;;  %1243 = vmatpush.msra.mxu3 %v1242_v18  ;;  %v3829_v2 = vand.u32 4294901760, %v3143_v33  ;;  %v1282_v18 = vand.u32 4294901760, %v3425_v43  ;;  %v1184_v33 = vsub.f32 %v3414_v37, %v1183_v10  ;;  %v1272_v51 = vand.u32 4294901760, %v1271_v26 }
  0xa3   :  { %1094 = vmatpush.msra.mxu0 %v3828_v62  ;;  %1170 = vmatpush.msra.mxu2 %v3319_v27 }
  0xa4   :  { %1129 = vmatpush.msra.mxu1 %v3030_v32  ;;  %1249 = vmatpush.msra.mxu3 %v1248_v42  ;;  %v1277_v32 = vsub.f32 %v3411_v61, %v1276_v59  ;;  %v1283_v5 = vsub.f32 %v3425_v43, %v1282_v18 }
  0xa5   :  { %1098 = vmatpush.msra.mxu0 %v3829_v2  ;;  %1172 = vmatpush.msra.mxu2 %v3334_v44 }
  0xa6   :  { %1131 = vmatpush.msra.mxu1 %v3046_v35  ;;  %1255 = vmatpush.msra.mxu3 %v1254_v58  ;;  %v3831_v35 = vand.u32 4294901760, %v3191_v23  ;;  %v1278_v42 = vand.u32 4294901760, %v1277_v32  ;;  %v1284_v23 = vand.u32 4294901760, %v1283_v5  ;;  %v1517_v5 = vld [vmem:[%s3721_s2] sm:$0xff] }
  0xa7   :  { %1102 = vmatpush.msra.mxu0 %v3830_v17  ;;  %1174 = vmatpush.msra.mxu2 %v3347_v40 }
  0xa8   :  { %1133 = vmatpush.msra.mxu1 %v3061_v41  ;;  %1261 = vmatpush.msra.mxu3 %v1260_v39  ;;  %v1185_v41 = vand.u32 4294901760, %v1184_v33  ;;  %v1521_v33 = vld [vmem:[%s3721_s2 + $0x20] sm:$0xff] }
  0xa9   :  { %1106 = vmatpush.msra.mxu0 %v3831_v35  ;;  %1176 = vmatpush.msra.mxu2 %v3369_v56 }
  0xaa   :  { %1135 = vmatpush.msra.mxu1 %v3076_v1  ;;  %1267 = vmatpush.msra.mxu3 %v1266_v12  ;;  %v3832_v1 = vand.u32 4294901760, %v3184_v22 }
  0xab   :  { %1108 = vmatmul.f32.vlgmr.msra.gmra.mxu0 %v3087_v36  ;;  %1178 = vmatpush.msra.mxu2 %v3385_v55 }
  0xac   :  { %1293 = vmatpush.msrb.mxu0 %v3184_v22  ;;  %1137 = vmatpush.msra.mxu1 %v3093_v7  ;;  %v3833_v7 = vand.u32 4294901760, %v3208_v52 }
  0xad   :  { %1273 = vmatpush.msra.mxu3 %v1272_v51  ;;  %1180 = vmatpush.msra.mxu2 %v3400_v45  ;;  %v1543_v51 = vand.u32 4294901760, %v1521_v33 }
  0xae   :  { %1296 = vmatpush.msrb.mxu0 %v3208_v52  ;;  %1139 = vmatpush.msra.mxu1 %v3105_v53  ;;  %v3834_v53 = vand.u32 4294901760, %v3221_v20 }
  0xaf   :  { %1279 = vmatpush.msra.mxu3 %v1278_v42  ;;  %1186 = vmatmul.f32.vlgmr.msra.gmra.mxu2 %v1185_v41  ;;  %v1571_v42 = vsub.f32 %v1521_v33, %v1543_v51  ;;  %v1545_v41 = vand.u32 4294901760, %v1517_v5 }
  0xb0   :  { %1299 = vmatpush.msrb.mxu0 %v3221_v20  ;;  %1387 = vmatpush.msrb.mxu2 %v3832_v1 }
  0xb1   :  { %1141 = vmatpush.msra.mxu1 %v3132_v14  ;;  %1285 = vmatpush.msra.mxu3 %v1284_v23  ;;  %v3835_v14 = vand.u32 4294901760, %v3229_v63  ;;  %v1572_v23 = vand.u32 4294901760, %v1571_v42  ;;  %v1577_v1 = vsub.f32 %v1517_v5, %v1545_v41 }
  0xb2   :  { %1287 = vmatmul.f32.vlgmr.msra.gmra.mxu3 %v3387_v6  ;;  %1302 = vmatpush.msrb.mxu0 %v3229_v63  ;;  %v3838_v63 = vand.u32 4294901760, %v3285_v15 }
  0xb3   :  { %1391 = vmatpush.msrb.mxu2 %v3833_v7  ;;  %1454 = vmatpush.msrb.mxu3 %v3148_v46  ;;  %v1573_v7 = vsub.f32 %v1571_v42, %v1572_v23 }
  0xb4   :  { %1143 = vmatpush.msra.mxu1 %v3157_v19  ;;  %1305 = vmatpush.msrb.mxu0 %v3243_v28  ;;  %v3840_v19 = vand.u32 4294901760, %v3317_v50 }
  0xb5   :  { %1145 = vmatmul.f32.vlgmr.msra.gmra.mxu1 %v3087_v36  ;;  %1395 = vmatpush.msrb.mxu2 %v3834_v53  ;;  %v3836_v36 = vand.u32 4294901760, %v3243_v28  ;;  %v1578_v53 = vand.u32 4294901760, %v1577_v1 }
  0xb6   :  { %1346 = vmatpush.msrb.mxu1 %v3148_v46  ;;  %1456 = vmatpush.msrb.mxu3 %v3173_v25  ;;  %v3837_v46 = vand.u32 4294901760, %v3268_v54 }
  0xb7   :  { %1308 = vmatpush.msrb.mxu0 %v3268_v54  ;;  %1399 = vmatpush.msrb.mxu2 %v3835_v14 }
  0xb8   :  { %1348 = vmatpush.msrb.mxu1 %v3173_v25  ;;  %1458 = vmatpush.msrb.mxu3 %v3193_v8 }
  0xb9   :  { %1311 = vmatpush.msrb.mxu0 %v3285_v15  ;;  %1403 = vmatpush.msrb.mxu2 %v3836_v36 }
  0xba   :  { %1350 = vmatpush.msrb.mxu1 %v3193_v8  ;;  %1460 = vmatpush.msrb.mxu3 %v3201_v11  ;;  %v3839_v8 = vand.u32 4294901760, %v3302_v13 }
  0xbb   :  { %1314 = vmatpush.msrb.mxu0 %v3302_v13  ;;  %1407 = vmatpush.msrb.mxu2 %v3837_v46  ;;  %v1574_v46 = vand.u32 4294901760, %v1573_v7 }
  0xbc   :  { %1352 = vmatpush.msrb.mxu1 %v3201_v11  ;;  %1462 = vmatpush.msrb.mxu3 %v3213_v3 }
  0xbd   :  { %1317 = vmatpush.msrb.mxu0 %v3317_v50  ;;  %1411 = vmatpush.msrb.mxu2 %v3838_v63  ;;  %v164_v52 = vpop.f32.mrf.mxu0  ;;  %v1579_v63 = vsub.f32 %v1577_v1, %v1578_v53 }
  0xbe   :  { %1354 = vmatpush.msrb.mxu1 %v3213_v3  ;;  %1464 = vmatpush.msrb.mxu3 %v3236_v31  ;;  %v3841_v3 = vand.u32 4294901760, %v3332_v30 }
  0xbf   :  { %1320 = vmatpush.msrb.mxu0 %v3332_v30  ;;  %1415 = vmatpush.msrb.mxu2 %v3839_v8 }
  0xc0   :  { %1356 = vmatpush.msrb.mxu1 %v3236_v31  ;;  %1466 = vmatpush.msrb.mxu3 %v3254_v16  ;;  %v3842_v31 = vand.u32 4294901760, %v3345_v49 }
  0xc1   :  { %1323 = vmatpush.msrb.mxu0 %v3345_v49  ;;  %1419 = vmatpush.msrb.mxu2 %v3840_v19  ;;  %v1580_v19 = vand.u32 4294901760, %v1579_v63 }
  0xc2   :  { %1358 = vmatpush.msrb.mxu1 %v3254_v16  ;;  %1468 = vmatpush.msrb.mxu3 %v3270_v9 }
  0xc3   :  { %1326 = vmatpush.msrb.mxu0 %v3361_v47  ;;  %1423 = vmatpush.msrb.mxu2 %v3841_v3  ;;  %v1522_v3 = vld [vmem:[%s3721_s2 + $0x28] sm:$0xff] }
  0xc4   :  { %1360 = vmatpush.msrb.mxu1 %v3270_v9  ;;  %1470 = vmatpush.msrb.mxu3 %v3287_v29 }
  0xc5   :  { %1329 = vmatpush.msrb.mxu0 %v3377_v60  ;;  %1427 = vmatpush.msrb.mxu2 %v3842_v31  ;;  %v3565_v31 = vand.u32 4294901760, %v1522_v3 }
  0xc6   :  { %1362 = vmatpush.msrb.mxu1 %v3287_v29  ;;  %1472 = vmatpush.msrb.mxu3 %v3304_v57 }
  0xc7   :  { %1332 = vmatpush.msrb.mxu0 %v3398_v0  ;;  %1431 = vmatpush.msrb.mxu2 %v1258_v38  ;;  %v265_v16 = vpop.f32.mrf.mxu1 }
  0xc8   :  { %1364 = vmatpush.msrb.mxu1 %v3304_v57  ;;  %1474 = vmatpush.msrb.mxu3 %v3319_v27  ;;  %v266_v20 = vadd.f32 %v265_v16, %v164_v52  ;;  %v1518_v52 = vld [vmem:[%s3721_s2 + $0x8] sm:$0xff] }
  0xc9   :  { %1335 = vmatpush.msrb.mxu0 %v3411_v61  ;;  %1435 = vmatpush.msrb.mxu2 %v1264_v21  ;;  %v319_v25 = vpop.f32.mrf.mxu2  ;;  %v358_v28 = vpop.f32.mrf.mxu3 }
  0xca   :  { %1366 = vmatpush.msrb.mxu1 %v3319_v27  ;;  %1476 = vmatpush.msrb.mxu3 %v3334_v44  ;;  %v320_v22 = vadd.f32 %v319_v25, %v266_v20  ;;  %v3572_v20 = vsub.f32 %v1522_v3, %v3565_v31  ;;  %v3574_v25 = vand.u32 4294901760, %v1518_v52 }
  0xcb   :  { %1338 = vmatpush.msrb.mxu0 %v3425_v43  ;;  %1439 = vmatpush.msrb.mxu2 %v1270_v4 }
  0xcc   :  { %1368 = vmatpush.msrb.mxu1 %v3334_v44  ;;  %1478 = vmatpush.msrb.mxu3 %v3347_v40  ;;  %v359_v11 = vadd.f32 %v358_v28, %v320_v22  ;;  %v1731_v28 = vand.u32 4294901760, %v3572_v20 }
  0xcd   :  { %1341 = vmatmul.f32.vlgmr.msrb.gmra.mxu0 %v3414_v37  ;;  %1443 = vmatpush.msrb.mxu2 %v1276_v59 }
  0xce   :  { %1370 = vmatpush.msrb.mxu1 %v3347_v40  ;;  %1480 = vmatpush.msrb.mxu3 %v3369_v56  ;;  %v427_v9 = vpop.f32.mrf.mxu0 }
  0xcf   :  { %1447 = vmatpush.msrb.mxu2 %v1282_v18  ;;  %v428_v57 = vadd.f32 %v427_v9, %v359_v11  ;;  %1544 = vmatpush.msra.mxu0 %v1543_v51  ;;  %v3579_v11 = vsub.f32 %v1518_v52, %v3574_v25 }
  0xd0   :  { %1372 = vmatpush.msrb.mxu1 %v3369_v56  ;;  %1482 = vmatpush.msrb.mxu3 %v3385_v55 }
  0xd1   :  { %1449 = vmatmul.f32.vlgmr.msrb.gmra.mxu2 %v3387_v6  ;;  %v464_v40 = vpop.f32.mrf.mxu1  ;;  %1546 = vmatpush.msra.mxu0 %v1545_v41 }
  0xd2   :  { %1374 = vmatpush.msrb.mxu1 %v3385_v55  ;;  %1484 = vmatpush.msrb.mxu3 %v3400_v45  ;;  %v465_v54 = vadd.f32 %v464_v40, %v428_v57  ;;  %v505_v15 = vpop.f32.mrf.mxu2  ;;  %v1732_v57 = vsub.f32 %v3572_v20, %v1731_v28  ;;  %v1737_v40 = vand.u32 4294901760, %v3579_v11 }
  0xd3   :  { %1486 = vmatmul.f32.vlgmr.msrb.gmra.mxu3 %v3387_v6  ;;  %1603 = vmatpush.msra.mxu2 %v1571_v42 }
  0xd4   :  { %1376 = vmatpush.msrb.mxu1 %v3400_v45  ;;  %v506_v29 = vadd.f32 %v505_v15, %v465_v54  ;;  %1628 = vmatpush.msra.mxu3 %v1543_v51 }
  0xd5   :  { %1380 = vmatmul.f32.vlgmr.msrb.gmra.mxu1 %v1183_v10  ;;  %v606_v13 = vpop.f32.mrf.mxu3  ;;  %1606 = vmatpush.msra.mxu2 %v1577_v1 }
  0xd6   :  { %v607_v27 = vadd.f32 %v606_v13, %v506_v29  ;;  %1630 = vmatpush.msra.mxu3 %v1545_v41  ;;  %1655 = vmatpush.msrb.mxu0 %v1572_v23  ;;  %v1733_v29 = vand.u32 4294901760, %v1732_v57  ;;  %v1738_v13 = vsub.f32 %v3579_v11, %v1737_v40 }
  0xd7   :  { %1575 = vmatpush.msra.mxu1 %v1574_v46  ;;  %1703 = vmatpush.msrb.mxu2 %v3565_v31 }
  0xd8   :  { %1659 = vmatpush.msrb.mxu0 %v1578_v53  ;;  %1734 = vmatpush.msrb.mxu3 %v1733_v29 }
  0xd9   :  { %1581 = vmatpush.msra.mxu1 %v1580_v19  ;;  %1705 = vmatpush.msrb.mxu2 %v3574_v25 }
  0xdb   :  { %1680 = vmatpush.msrb.mxu1 %v1543_v51 }
  0xdd   :  { %1682 = vmatpush.msrb.mxu1 %v1545_v41 }
  0xe4   :  { %v660_v50 = vpop.f32.mrf.mxu0 }
  0xe5   :  { %v661_v30 = vadd.f32 %v660_v50, %v607_v27 }
  0xee   :  { %v699_v60 = vpop.f32.mrf.mxu1  ;;  %v768_v38 = vpop.f32.mrf.mxu2 }
  0xef   :  { %v700_v44 = vadd.f32 %v699_v60, %v661_v30  ;;  %v1739_v60 = vand.u32 4294901760, %v1738_v13 }
  0xf1   :  { %v769_v49 = vadd.f32 %v768_v38, %v700_v44  ;;  %v805_v21 = vpop.f32.mrf.mxu3  ;;  %1740 = vmatpush.msrb.mxu3 %v1739_v60  ;;  %v1523_v38 = vld [vmem:[%s3721_s2 + $0x30] sm:$0xff] }
  0xf3   :  { %v806_v56 = vadd.f32 %v805_v21, %v769_v49 }
 0x106   :  { %v846_v47 = vpop.f32.mrf.mxu0 }
 0x107   :  { %v847_v6 = vadd.f32 %v846_v47, %v806_v56  ;;  %v1861_v47 = vand.u32 4294901760, %v1523_v38  ;;  %v1519_v56 = vld [vmem:[%s3721_s2 + $0x10] sm:$0xff] }
 0x110   :  { %v947_v55 = vpop.f32.mrf.mxu1  ;;  %v1001_v45 = vpop.f32.mrf.mxu2 }
 0x111   :  { %v948_v0 = vadd.f32 %v947_v55, %v847_v6 }
 0x113   :  { %v1002_v61 = vadd.f32 %v1001_v45, %v948_v0  ;;  %v1040_v37 = vpop.f32.mrf.mxu3  ;;  %v3590_v45 = vand.u32 4294901760, %v1519_v56 }
 0x115   :  { %v1041_v24 = vadd.f32 %v1040_v37, %v1002_v61  ;;  %v3592_v37 = vsub.f32 %v1523_v38, %v1861_v47 }
 0x128   :  { %v1109_v34 = vpop.f32.mrf.mxu0 }
 0x129   :  { %v1110_v43 = vadd.f32 %v1109_v34, %v1041_v24 }
 0x132   :  { %v1146_v4 = vpop.f32.mrf.mxu1  ;;  %v1187_v48 = vpop.f32.mrf.mxu2 }
 0x133   :  { %v1147_v58 = vadd.f32 %v1146_v4, %v1110_v43  ;;  %v3595_v43 = vsub.f32 %v1519_v56, %v3590_v45 }
 0x135   :  { %v1188_v62 = vadd.f32 %v1187_v48, %v1147_v58  ;;  %v1288_v59 = vpop.f32.mrf.mxu3  ;;  %v1890_v48 = vand.u32 4294901760, %v3592_v37 }
 0x137   :  { %v1289_v39 = vadd.f32 %v1288_v59, %v1188_v62  ;;  %v1524_v59 = vld [vmem:[%s3721_s2 + $0x38] sm:$0xff] }
 0x14a   :  { %v1342_v10 = vpop.f32.mrf.mxu0 }
 0x14b   :  { %v1343_v2 = vadd.f32 %v1342_v10, %v1289_v39  ;;  %v1896_v39 = vand.u32 4294901760, %v3595_v43 }
 0x14d   :  { %v1897_v33 = vsub.f32 %v3595_v43, %v1896_v39 }
 0x14f   :  { %v1898_v41 = vand.u32 4294901760, %v1897_v33 }
 0x152   :  { %v1381_v26 = vpop.f32.mrf.mxu1 }
 0x153   :  { %v1382_v18 = vadd.f32 %v1381_v26, %v1343_v2  ;;  %v1520_v2 = vld [vmem:[%s3721_s2 + $0x18] sm:$0xff]  ;;  %v1891_v26 = vsub.f32 %v3592_v37, %v1890_v48 }
 0x154   :  { %v1450_v12 = vpop.f32.mrf.mxu2 }
 0x155   :  { %v1451_v17 = vadd.f32 %v1450_v12, %v1382_v18  ;;  %v2020_v18 = vand.u32 4294901760, %v1524_v59 }
 0x156   :  { %v1487_v32 = vpop.f32.mrf.mxu3 }
 0x157   :  { %v1488_v35 = vadd.f32 %v1487_v32, %v1451_v17  ;;  %v2022_v17 = vand.u32 4294901760, %v1520_v2  ;;  %v2048_v51 = vsub.f32 %v1524_v59, %v2020_v18 }
 0x159   :  { %2268 = vrsqrt.f32 %v1488_v35  ;;  %vm1497_vm0 = vcmp.eq.f32.partialorder %v1488_v35, inf  ;;  %v1500_v15 = vand.u32 2147483648, %v1488_v35  ;;  %vm1499_vm1 = vcmp.eq.f32.partialorder %v1488_v35, 0.0 }
 0x15a   :  { %v2054_v42 = vsub.f32 %v1520_v2, %v2022_v17  ;;  %v2049_v23 = vand.u32 4294901760, %v2048_v51 }
 0x15c   :  { %v2055_v1 = vand.u32 4294901760, %v2054_v42  ;;  %v2050_v7 = vsub.f32 %v2048_v51, %v2049_v23 }
 0x15e   :  { %v2056_v53 = vsub.f32 %v2054_v42, %v2055_v1 }
 0x15f   :  { %v2269_v14 = vpop.eup %2268 }
 0x160   :  { %v1491_v36 = vmul.f32 %v2269_v14, %v1488_v35 }
 0x162   :  { %v1492_v8 = vmul.f32 %v2269_v14, %v1491_v36  ;;  %v2057_v36 = vand.u32 4294901760, %v2056_v53 }
 0x164   :  { %v1493_v16 = vmul.f32 0.5, %v1492_v8 }
 0x166   :  { %v1494_v22 = vsub.f32 1.5, %v1493_v16 }
 0x168   :  { %v1495_v9 = vmul.f32 %v2269_v14, %v1494_v22  ;;  %v2051_v14 = vand.u32 4294901760, %v2050_v7 }
 0x16a   :  { %v1496_v54 = vmul.f32 %v1495_v9, %v1488_v35 }
 0x16c   :  { %v1498_v50 = vsel %vm1497_vm0, %v1488_v35, %v1496_v54  ;;  %v1892_v35 = vand.u32 4294901760, %v1891_v26  ;;  %vm2182_vm0 = vcmask 1042433  }
 0x16d   :  { %v1501_v27 = vsel %vm1499_vm1, %v1500_v15, %v1498_v50  ;;  %vm2188_vm1 = vcmask 1043458  }
 0x16e   :  { %v1502_v30 = vadd.f32 0.0001, %v1501_v27 }
 0x170   :  { %2270 = vrcp.f32 %v1502_v30  ;;  %v1514_v55 = vand.u32 2147483648, %v1502_v30  ;;  %v1512_v0 = vand.u32 2147483647, %v1502_v30  ;;  %vm1508_vm3 = vweird.f32 %v1502_v30 }
 0x172   :  { %v1515_v34 = vor.u32 1.1754944e-38, %v1514_v55  ;;  %vm1513_vm6 = vcmp.eq.f32.partialorder %v1512_v0, 8.507059e+37 }
 0x176   :  { %v2271_v44 = vpop.eup %2270 }
 0x177   :  { %v1504_v49 = vmul.f32 %v2271_v44, %v1502_v30  ;;  %vm1509_vm2 = vweird.f32 %v2271_v44 }
 0x178   :  { %vm1510_vm4 = vmor %vm1508_vm3, %vm1509_vm2  ;;  %vm2194_vm2 = vcmask 1044483   ;;  %vm2200_vm3 = vcmask 1045508  }
 0x179   :  { %v1505_v21 = vsub.f32 1.0, %v1504_v49 }
 0x17b   :  { %v1506_v6 = vmul.f32 %v2271_v44, %v1505_v21 }
 0x17d   :  { %v1507_v61 = vadd.f32 %v2271_v44, %v1506_v6 }
 0x17f   :  { %v1511_v24 = vsel %vm1510_vm4, %v2271_v44, %v1507_v61  ;;  %vm2206_vm4 = vcmask 1046533  }
 0x180   :  { %v1516_v4 = vsel %vm1513_vm6, %v1515_v34, %v1511_v24  ;;  %vm2216_vm6 = vcmask 1046529  }
 0x181   :  { %v1527_v58 = vsel %vm1525_vm5, %v1516_v4, 0  ;;  %vm3845_vm5 = vcmask 1046534  }
 0x182   :  { %v3598_v62 = vand.u32 4294901760, %v1527_v58 }
 0x184   :  { %1583 = vmatmul.f32.vlgmr.msra.gmra.mxu1 %v3598_v62  ;;  %v3605_v10 = vsub.f32 %v1527_v58, %v3598_v62  ;;  %v2235_v58 = vlaneseq }
 0x185   :  { %1787 = vmatpush.msra.mxu1 %v3565_v31 }
 0x186   :  { %1609 = vmatmul.f32.vlgmr.msra.gmra.mxu2 %v3605_v10  ;;  %v3615_v12 = vand.u32 4294901760, %v3605_v10  ;;  %vm3650_vm13 = vcmp.lt.s32.totalorder %v2235_v58, 512 }
 0x187   :  { %1814 = vmatpush.msra.mxu2 %v1731_v28  ;;  %1789 = vmatpush.msra.mxu1 %v3574_v25 }
 0x188   :  { %1634 = vmatmul.f32.vlgmr.msra.gmra.mxu3 %v3615_v12  ;;  %v1550_v32 = vsub.f32 %v3605_v10, %v3615_v12 }
 0x189   :  { %1839 = vmatpush.msra.mxu3 %v3565_v31  ;;  %1818 = vmatpush.msra.mxu2 %v1737_v40 }
 0x18a   :  { %v1551_v5 = vand.u32 4294901760, %v1550_v32 }
 0x18b   :  { %1841 = vmatpush.msra.mxu3 %v3574_v25 }
 0x18c   :  { %1552 = vmatmul.f32.vlgmr.msra.gmra.mxu0 %v1551_v5  ;;  %1684 = vmatmul.f32.vlgmr.msrb.gmra.mxu1 %v3598_v62 }
 0x18d   :  { %1762 = vmatpush.msra.mxu0 %v3572_v20  ;;  %1893 = vmatpush.msrb.mxu1 %v1892_v35 }
 0x18e   :  { %1711 = vmatmul.f32.vlgmr.msrb.gmra.mxu2 %v1551_v5 }
 0x18f   :  { %1765 = vmatpush.msra.mxu0 %v3579_v11  ;;  %1921 = vmatpush.msrb.mxu2 %v3592_v37 }
 0x190   :  { %1742 = vmatmul.f32.vlgmr.msrb.gmra.mxu3 %v3598_v62  ;;  %1899 = vmatpush.msrb.mxu1 %v1898_v41 }
 0x191   :  { %1946 = vmatpush.msrb.mxu3 %v1861_v47  ;;  %1924 = vmatpush.msrb.mxu2 %v3595_v43 }
 0x193   :  { %1948 = vmatpush.msrb.mxu3 %v3590_v45 }
 0x194   :  { %1661 = vmatmul.f32.vlgmr.msrb.gmra.mxu0 %v3598_v62  ;;  %1793 = vmatmul.f32.vlgmr.msra.gmra.mxu1 %v3615_v12 }
 0x195   :  { %1862 = vmatpush.msrb.mxu0 %v1861_v47  ;;  %1998 = vmatpush.msra.mxu1 %v1861_v47 }
 0x196   :  { %1820 = vmatmul.f32.vlgmr.msra.gmra.mxu2 %v3598_v62 }
 0x197   :  { %1864 = vmatpush.msrb.mxu0 %v3590_v45  ;;  %2021 = vmatpush.msra.mxu2 %v2020_v18 }
 0x198   :  { %1843 = vmatmul.f32.vlgmr.msra.gmra.mxu3 %v3598_v62  ;;  %2000 = vmatpush.msra.mxu1 %v3590_v45 }
 0x199   :  { %2052 = vmatpush.msra.mxu3 %v2051_v14  ;;  %2023 = vmatpush.msra.mxu2 %v2022_v17 }
 0x19b   :  { %2058 = vmatpush.msra.mxu3 %v2057_v36 }
 0x19c   :  { %1768 = vmatmul.f32.vlgmr.msra.gmra.mxu0 %v3605_v10  ;;  %1901 = vmatmul.f32.vlgmr.msrb.gmra.mxu1 %v3598_v62 }
 0x19d   :  { %1973 = vmatpush.msra.mxu0 %v1890_v48  ;;  %2105 = vmatpush.msrb.mxu1 %v2020_v18 }
 0x19e   :  { %1927 = vmatmul.f32.vlgmr.msrb.gmra.mxu2 %v3605_v10 }
 0x19f   :  { %1977 = vmatpush.msra.mxu0 %v1896_v39  ;;  %2132 = vmatpush.msrb.mxu2 %v2049_v23 }
 0x1a0   :  { %1952 = vmatmul.f32.vlgmr.msrb.gmra.mxu3 %v3615_v12  ;;  %2107 = vmatpush.msrb.mxu1 %v2022_v17 }
 0x1a1   :  { %2157 = vmatpush.msrb.mxu3 %v2020_v18  ;;  %2136 = vmatpush.msrb.mxu2 %v2055_v1 }
 0x1a3   :  { %2159 = vmatpush.msrb.mxu3 %v2022_v17 }
 0x1a4   :  { %1870 = vmatmul.f32.vlgmr.msrb.gmra.mxu0 %v1551_v5  ;;  %2002 = vmatmul.f32.vlgmr.msra.gmra.mxu1 %v3598_v62 }
 0x1a5   :  { %2080 = vmatpush.msrb.mxu0 %v2048_v51 }
 0x1a6   :  { %2029 = vmatmul.f32.vlgmr.msra.gmra.mxu2 %v1551_v5 }
 0x1a7   :  { %2083 = vmatpush.msrb.mxu0 %v2054_v42 }
 0x1a8   :  { %2060 = vmatmul.f32.vlgmr.msra.gmra.mxu3 %v3598_v62 }
 0x1ac   :  { %1979 = vmatmul.f32.vlgmr.msra.gmra.mxu0 %v3598_v62  ;;  %2111 = vmatmul.f32.vlgmr.msrb.gmra.mxu1 %v3615_v12 }
 0x1ae   :  { %2138 = vmatmul.f32.vlgmr.msrb.gmra.mxu2 %v3598_v62 }
 0x1b0   :  { %2161 = vmatmul.f32.vlgmr.msrb.gmra.mxu3 %v3598_v62 }
 0x1b4   :  { %2086 = vmatmul.f32.vlgmr.msrb.gmra.mxu0 %v3605_v10 }
 0x201   :  { %v1584_v46 = vpop.f32.mrf.mxu1 }
 0x209   :  { %v1553_v63 = vpop.f32.mrf.mxu0  ;;  %v1610_v8 = vpop.f32.mrf.mxu2 }
 0x20a   :  { %v1685_v19 = vpop.f32.mrf.mxu1  ;;  %v1585_v29 = vadd.f32 %v1584_v46, %v1553_v63 }
 0x20b   :  { %v1635_v3 = vpop.f32.mrf.mxu3 }
 0x20c   :  { %v1611_v44 = vadd.f32 %v1610_v8, %v1585_v29  ;;  %v2273_v29 = vld [vmem:[%s3719_s0 + $0x4] sm:$0xf] }
 0x20e   :  { %v1636_v47 = vadd.f32 %v1635_v3, %v1611_v44  ;;  %v2276_v44 = vld [vmem:[%s3719_s0 + $0x10] sm:$0xf] }
 0x211   :  { %v1662_v31 = vpop.f32.mrf.mxu0  ;;  %v1712_v16 = vpop.f32.mrf.mxu2 }
 0x212   :  { %v1794_v20 = vpop.f32.mrf.mxu1  ;;  %v1663_v45 = vadd.f32 %v1662_v31, %v1636_v47  ;;  %v2278_v47 = vld [vmem:[%s3719_s0 + $0x18] sm:$0xf] }
 0x213   :  { %v1743_v52 = vpop.f32.mrf.mxu3 }
 0x214   :  { %v1744_v40 = vadd.f32 %v1743_v52, %v1712_v16  ;;  %v1686_v48 = vadd.f32 %v1685_v19, %v1663_v45 }
 0x219   :  { %v1769_v25 = vpop.f32.mrf.mxu0  ;;  %v1821_v22 = vpop.f32.mrf.mxu2 }
 0x21a   :  { %v1902_v11 = vpop.f32.mrf.mxu1  ;;  %v1770_v15 = vadd.f32 %v1769_v25, %v1744_v40  ;;  %v2272_v40 = vld [vmem:[%s3719_s0] sm:$0xf] }
 0x21b   :  { %v1844_v28 = vpop.f32.mrf.mxu3 }
 0x21c   :  { %v1795_v50 = vadd.f32 %v1794_v20, %v1770_v15 }
 0x21e   :  { %v1822_v49 = vadd.f32 %v1821_v22, %v1795_v50  ;;  %v2274_v50 = vld [vmem:[%s3719_s0 + $0x8] sm:$0xf] }
 0x220   :  { %v1845_v6 = vadd.f32 %v1844_v28, %v1822_v49  ;;  %v2277_v49 = vld [vmem:[%s3719_s0 + $0x14] sm:$0xf] }
 0x221   :  { %v1871_v9 = vpop.f32.mrf.mxu0  ;;  %v1928_v57 = vpop.f32.mrf.mxu2 }
 0x222   :  { %v1903_v13 = vadd.f32 %v1902_v11, %v1871_v9  ;;  %v2003_v27 = vpop.f32.mrf.mxu1  ;;  %v2169_v4 = vrot.slane %v1845_v6, 7 }
 0x223   :  { %v1953_v54 = vpop.f32.mrf.mxu3 }
 0x224   :  { %v1929_v38 = vadd.f32 %v1928_v57, %v1903_v13  ;;  %v2173_v2 = vsel %vm2172_vm7, %v1686_v48, %v2169_v4  ;;  %v2179_v26 = vsel %vm2178_vm9, %v1686_v48, %v2169_v4  ;;  %v2185_v12 = vsel %vm2174_vm8, %v1686_v48, %v2169_v4 }
 0x225   :  { %v2191_v17 = vsel %vm2180_vm10, %v1686_v48, %v2169_v4  ;;  %v2197_v35 = vsel %vm2186_vm11, %v1686_v48, %v2169_v4  ;;  %v2203_v51 = vsel %vm2192_vm12, %v1686_v48, %v2169_v4  ;;  %v2209_v5 = vsel %vm3845_vm5, %v1686_v48, %v2169_v4 }
 0x226   :  { %v1954_v56 = vadd.f32 %v1953_v54, %v1929_v38  ;;  %v2214_v42 = vsel %vm2204_vm14, %v2169_v4, %v1686_v48 }
 0x229   :  { %v1980_v60 = vpop.f32.mrf.mxu0  ;;  %v2030_v30 = vpop.f32.mrf.mxu2 }
 0x22a   :  { %v1981_v61 = vadd.f32 %v1980_v60, %v1954_v56  ;;  %v2112_v34 = vpop.f32.mrf.mxu1  ;;  %v2275_v60 = vld [vmem:[%s3719_s0 + $0xc] sm:$0xf] }
 0x22b   :  { %v2061_v21 = vpop.f32.mrf.mxu3 }
 0x22c   :  { %v2062_v55 = vadd.f32 %v2061_v21, %v2030_v30  ;;  %v2004_v62 = vadd.f32 %v2003_v27, %v1981_v61 }
 0x22e   :  { %v2170_v32 = vrot.slane %v2004_v62, 6 }
 0x231   :  { %v2087_v0 = vpop.f32.mrf.mxu0  ;;  %v2139_v43 = vpop.f32.mrf.mxu2 }
 0x232   :  { %v2088_v37 = vadd.f32 %v2087_v0, %v2062_v55  ;;  %v2279_v55 = vld [vmem:[%s3719_s0 + $0x1c] sm:$0xf] }
 0x233   :  { %v2162_v10 = vpop.f32.mrf.mxu3 }
 0x234   :  { %v2113_v24 = vadd.f32 %v2112_v34, %v2088_v37 }
 0x236   :  { %v2140_v59 = vadd.f32 %v2139_v43, %v2113_v24 }
 0x238   :  { %v2163_v39 = vadd.f32 %v2162_v10, %v2140_v59 }
 0x23a   :  { %v2171_v33 = vrot.slane %v2163_v39, 5 }
 0x23c   :  { %v2175_v41 = vsel %vm2174_vm8, %v2170_v32, %v2171_v33  ;;  %v2181_v23 = vsel %vm2180_vm10, %v2170_v32, %v2171_v33  ;;  %v2187_v1 = vsel %vm2186_vm11, %v2170_v32, %v2171_v33  ;;  %v2193_v7 = vsel %vm2192_vm12, %v2170_v32, %v2171_v33 }
 0x23d   :  { %v2177_v53 = vsel %vm2176_vm15, %v2173_v2, %v2175_v41  ;;  %v2183_v14 = vsel %vm2182_vm0, %v2179_v26, %v2181_v23  ;;  %v2189_v36 = vsel %vm2188_vm1, %v2185_v12, %v2187_v1  ;;  %v2195_v46 = vsel %vm2194_vm2, %v2191_v17, %v2193_v7 }
 0x23e   :  { %v2184_v63 = vrot.slane %v2183_v14, 1  ;;  %v2190_v8 = vrot.slane %v2189_v36, 2  ;;  %v2196_v19 = vrot.slane %v2195_v46, 3  ;;  %v2199_v3 = vsel %vm3845_vm5, %v2170_v32, %v2171_v33 }
 0x23f   :  { %v2201_v31 = vsel %vm2200_vm3, %v2197_v35, %v2199_v3  ;;  %v2205_v16 = vsel %vm2204_vm14, %v2171_v33, %v2170_v32  ;;  %v2210_v52 = vsel %vm2172_vm7, %v2170_v32, %v2171_v33  ;;  %v2215_v20 = vsel %vm2178_vm9, %v2170_v32, %v2171_v33 }
 0x240   :  { %v2202_v25 = vrot.slane %v2201_v31, 4  ;;  %v2207_v22 = vsel %vm2206_vm4, %v2203_v51, %v2205_v16  ;;  %vm3846_vm8 = vcmask 1045504   ;;  %v2217_v11 = vsel %vm2216_vm6, %v2215_v20, %v2214_v42 }
 0x241   :  { %v2212_v28 = vsel %vm3846_vm8, %v2210_v52, %v2209_v5  ;;  %v2208_v9 = vrot.slane %v2207_v22, 5  ;;  %v2227_v54 = vmul.f32 %v2272_v40, %v2177_v53  ;;  %v2218_v15 = vrot.slane %v2217_v11, 7 }
 0x242   :  { %v2213_v57 = vrot.slane %v2212_v28, 6  ;;  %v2228_v13 = vmul.f32 %v2273_v29, %v2184_v63  ;;  %v2229_v27 = vmul.f32 %v2274_v50, %v2190_v8  ;;  %v2230_v30 = vmul.f32 %v2275_v60, %v2196_v19 }
 0x243   :  { %v2231_v38 = vmul.f32 %v2276_v44, %v2202_v25  ;;  %2239 = vst.msk [vmem:[#allocation2] sm:$0xf] %vm3650_vm13, %v2227_v54  ;;  %v2232_v21 = vmul.f32 %v2277_v49, %v2208_v9  ;;  %v2234_v6 = vmul.f32 %v2279_v55, %v2218_v15 }
 0x244   :  { %2240 = vst.msk [vmem:[#allocation2 + $0x4] sm:$0xf] %vm3650_vm13, %v2228_v13  ;;  %v2233_v56 = vmul.f32 %v2278_v47, %v2213_v57 }
 0x245   :  { %2241 = vst.msk [vmem:[#allocation2 + $0x8] sm:$0xf] %vm3650_vm13, %v2229_v27 }
 0x246   :  { %2242 = vst.msk [vmem:[#allocation2 + $0xc] sm:$0xf] %vm3650_vm13, %v2230_v30 }
 0x247   :  { %2243 = vst.msk [vmem:[#allocation2 + $0x10] sm:$0xf] %vm3650_vm13, %v2231_v38 }
 0x248   :  { %2244 = vst.msk [vmem:[#allocation2 + $0x14] sm:$0xf] %vm3650_vm13, %v2232_v21 }
 0x249   :  { %2245 = vst.msk [vmem:[#allocation2 + $0x18] sm:$0xf] %vm3650_vm13, %v2233_v56 }
 0x24a   :  { %2246 = vst.msk [vmem:[#allocation2 + $0x1c] sm:$0xf] %vm3650_vm13, %v2234_v6 }
 0x24b   :  { %2250 = vsyncadd [#allocation3], 448  ;;  %s2253_s0 = sshll.u32 %s3722_s3, 4  ;;  %s2306_s25 = smov [#allocation2]   ;;  %s2254_s0 = int_to_ptr.hbm [resolvable:$true] %s2253_s0 }
 0x24c   :  { %s2251_s26 = sshll.u32 %s2306_s25, 4  ;;  %s2307_s27 = smov 64   ;;  %s2252_s26 = int_to_ptr.vmem [resolvable:$true] %s2251_s26 }
 0x24d   :  { %s2308_s28 = smov 4  }
 0x24e   :  { %2259 = dma.vmem_to_hbm [thread:$0]  %s2252_s26, 64, %s2254_s0, [#allocation3], %s2307_s27, %s2307_s27, %s2308_s28  }
 0x24f   :  { %2304 = dma.done.wait [#allocation3], 512  }
 0x250   :  { %2305 = vsyncadd [#allocation3], 4294966784 }
 0x251   :  { %2264 = vsyncpa [#allocation3], 1 }

</bundles_post_ra>
